<compile_context>
chip_gen: v7x
topology: tpu7x:2x2x1
jax: 0.10.0
libtpu: 0.0.40
codegen_flags: <defaults>
</compile_context>

<pallas_src>
import functools

import jax
import jax.numpy as jnp
import numpy as np
from jax import lax
from jax.experimental import pallas as pl
from jax.experimental.pallas import tpu as pltpu

_BF16 = jnp.bfloat16
_F32 = jnp.float32


# ---------------------------------------------------------------------------
# small shared helpers (used by the kernel and by the numerics-matched reference)
# ---------------------------------------------------------------------------
def _mm(a, b):
    """MXU matmul: bf16 operands, f32 accumulation."""
    return jnp.dot(a.astype(_BF16), b.astype(_BF16), preferred_element_type=_F32)


def _mm_t(a, b):
    """a^T @ b (contract axis 0 of both) without materializing the transpose."""
    return lax.dot_general(a.astype(_BF16), b.astype(_BF16),
                           (((0,), (0,)), ((), ())),
                           preferred_element_type=_F32)


def _k_small_matmul(a, b):
    """a @ b for tiny contraction depth (K = pos_dim): VPU broadcast-FMAs.

    A K=2 contraction fills <1% of a 256-deep MXU and still pays a full
    push/pop, so do it as two multiply-adds in the (otherwise idle) VALU slot.
    """
    k = a.shape[1]
    out = a[:, 0:1] * b[0:1, :]
    for i in range(1, k):
        out = out + a[:, i:i + 1] * b[i:i + 1, :]
    return out


def _act(y, act):
    if act == "silu":
        return y * jax.nn.sigmoid(y)      # f32 VPU/EUP math
    if act == "relu":
        return jnp.maximum(y, 0.0)
    return y


# ---------------------------------------------------------------------------
# The single fused Pallas kernel (one batch element per grid step)
# ---------------------------------------------------------------------------
def _fused_forward_kernel(x_ref, pos_ref, wft_ref, bft_ref,
                          wqkv_ref, bqkv_ref, wfcp_ref, wfcf_ref, bfc_ref,
                          g_ref, beta_ref, w1_ref, b1_ref, w2_ref, b2_ref,
                          wr1_ref, br1_ref, wr2t_ref, br2_ref,
                          o_ref, *, n_layers, n_head, pos_dim, eps, act):
    n = x_ref.shape[1]
    d = wft_ref.shape[1]
    hd = d // n_head
    inv_n = 1.0 / n

    # hoisted casts (review: stop re-casting x / pos on every _mm call)
    x_bf = x_ref[0].astype(_BF16)            # (N, in_dim)
    pos = pos_ref[0].astype(_F32)            # (N, pd)
    pos_bf = pos.astype(_BF16)

    # --- K1: feature_transform ------------------------------------------------
    h = (jnp.dot(x_bf, wft_ref[...].astype(_BF16), preferred_element_type=_F32)
         + bft_ref[...])                      # (N, d) f32

    # pos^T pos / N : head- and layer-independent, computed once
    kv_pp = _mm_t(pos_bf, pos_bf) * inv_n     # (pd, pd) f32

    # --- K2: decoder layers (layer params stacked on a leading L axis) --------
    for l in range(n_layers):
        xl_bf = h.astype(_BF16)

        # fused QKV projection: one (N,d)@(d,3d) MXU matmul, bias added once
        qkv = _mm(xl_bf, wqkv_ref[l]) + bqkv_ref[l]        # (N, 3d) f32
        qkv_bf = qkv.astype(_BF16)

        wfcp_l = wfcp_ref[l].astype(_F32)                  # (H*pd, d)
        wfcf_bf = wfcf_ref[l].astype(_BF16)                # (H*hd, d) == (d, d)

        # sum over heads of the pos-row blocks of Wfc
        wfcp_sum = wfcp_l[0:pos_dim]
        for hh in range(1, n_head):
            wfcp_sum = wfcp_sum + wfcp_l[hh * pos_dim:(hh + 1) * pos_dim]

        # pos-channel contribution, Wfc folded through the kv blocks
        v_all = qkv_bf[:, 2 * d:]                          # (N, d) bf16
        kv_pf_full = _mm_t(pos_bf, v_all) * inv_n          # (pd, d)
        m_p = _k_small_matmul(kv_pp, wfcp_sum) + _mm(kv_pf_full, wfcf_bf)   # (pd, d)
        # att initialized from the broadcast bias (no zeros+add pass)
        att = _k_small_matmul(pos, m_p) + bfc_ref[l]       # (N, d)

        # q-channel contributions per head, Wfc folded into kv
        for hh in range(n_head):
            qh = qkv_bf[:, hh * hd:(hh + 1) * hd]                      # (N, hd)
            kh = qkv_bf[:, d + hh * hd: d + (hh + 1) * hd]
            vh = qkv_bf[:, 2 * d + hh * hd: 2 * d + (hh + 1) * hd]
            wfcp_h = wfcp_l[hh * pos_dim:(hh + 1) * pos_dim]           # (pd, d)
            wfcf_h = wfcf_bf[hh * hd:(hh + 1) * hd]                    # (hd, d)
            kv_fp = _mm_t(kh, pos_bf) * inv_n                          # (hd, pd)
            kv_ff = _mm_t(kh, vh) * inv_n                              # (hd, hd)
            m_q = _k_small_matmul(kv_fp, wfcp_h) + _mm(kv_ff, wfcf_h)  # (hd, d)
            att = att + _mm(qh, m_q)                                   # (N, d)

        # residual + LayerNorm (dropout1 = identity at inference)
        z = h + att
        mean = jnp.mean(z, axis=-1, keepdims=True)
        zc = z - mean
        var = jnp.mean(zc * zc, axis=-1, keepdims=True)
        x1 = zc * lax.rsqrt(var + eps) * g_ref[l] + beta_ref[l]

        # FeedForward + residual; the (N, dff) hidden never leaves vregs/VMEM
        hmid = _act(_mm(x1, w1_ref[l]) + b1_ref[l], act)
        h = x1 + _mm(hmid, w2_ref[l]) + b2_ref[l]

    # --- K3: regressor tail (Linear -> act -> Linear) --------------------------
    r = _act(_mm(h, wr1_ref[...]) + br1_ref[...], act)     # (N, dff) f32
    out_dim = o_ref.shape[-1]
    if out_dim == 1:
        # 1-output-column matmul -> VPU multiply + lane reduce (mirror the
        # bf16-operand convention so the reference check stays tight)
        w_row = wr2t_ref[...].astype(_BF16).astype(_F32)   # (1, dff)
        r_bf = r.astype(_BF16).astype(_F32)
        o = jnp.sum(r_bf * w_row, axis=-1, keepdims=True) + br2_ref[...]
    else:
        o = lax.dot_general(r.astype(_BF16), wr2t_ref[...].astype(_BF16),
                            (((1,), (1,)), ((), ())),
                            preferred_element_type=_F32) + br2_ref[...]
    o_ref[0] = o.astype(o_ref.dtype)


# ---------------------------------------------------------------------------
# Wrapper: ONE pallas_call for the entire forward pass
# ---------------------------------------------------------------------------
def pallas_forward(x, pos, kp, cfg):
    B, N, in_dim = x.shape
    d = cfg["n_hidden"]
    H = cfg["n_head"]
    pd = cfg["pos_dim"]
    dff = cfg["dim_feedforward"]
    out_dim = cfg["out_dim"]
    L = cfg["num_layers"] - 1

    kern = functools.partial(_fused_forward_kernel, n_layers=L, n_head=H,
                             pos_dim=pd, eps=cfg["eps"], act=cfg["activation"])

    def full(*shape):   # whole-array block, constant across the batch grid
        return pl.BlockSpec(shape, lambda b, _s=shape: (0,) * len(_s))

    return pl.pallas_call(
        kern,
        out_shape=jax.ShapeDtypeStruct((B, N, out_dim), x.dtype),
        grid=(B,),
        in_specs=[
            pl.BlockSpec((1, N, in_dim), lambda b: (b, 0, 0)),   # x
            pl.BlockSpec((1, N, pd), lambda b: (b, 0, 0)),       # pos
            full(in_dim, d), full(1, d),                         # feature_transform
            full(L, d, 3 * d), full(L, 1, 3 * d),                # fused QKV
            full(L, H * pd, d), full(L, d, d), full(L, 1, d),    # Wfc (pos/feat rows), bfc
            full(L, 1, d), full(L, 1, d),                        # LayerNorm gamma/beta
            full(L, d, dff), full(L, 1, dff),                    # FFN W1, b1
            full(L, dff, d), full(L, 1, d),                      # FFN W2, b2
            full(d, dff), full(1, dff),                          # regressor W1, b1
            full(out_dim, dff), full(1, out_dim),                # regressor W2^T, b2
        ],
        out_specs=pl.BlockSpec((1, N, out_dim), lambda b: (b, 0, 0)),
        compiler_params=pltpu.CompilerParams(dimension_semantics=("parallel",)),
    )(x, pos, kp["Wft"], kp["bft"], kp["Wqkv"], kp["bqkv"], kp["Wfc_p"],
      kp["Wfc_f"], kp["bfc"], kp["ln_g"], kp["ln_b"], kp["W1"], kp["b1"],
      kp["W2"], kp["b2"], kp["Wr1"], kp["br1"], kp["Wr2t"], kp["br2"])


# ---------------------------------------------------------------------------
# One-time (outside the hot path) re-layout of torch-style params for the kernel
# ---------------------------------------------------------------------------
def prepare_kernel_params(params, cfg):
    d = cfg["n_hidden"]
    H = cfg["n_head"]
    pd = cfg["pos_dim"]
    hd = d // H
    D = hd + pd

    kp = dict(Wft=params["Wft"], bft=params["bft"].reshape(1, -1),
              Wr1=params["Wr1"], br1=params["br1"].reshape(1, -1),
              Wr2t=params["Wr2"].T, br2=params["br2"].reshape(1, -1))

    wqkv, bqkv, wfcp, wfcf, bfc, ln_g, ln_b, W1, b1, W2, b2 = ([] for _ in range(11))
    for p in params["layers"]:
        wqkv.append(jnp.concatenate([p["Wq"], p["Wk"], p["Wv"]], axis=1))   # (d, 3d)
        bqkv.append(jnp.concatenate([p["bq"], p["bk"], p["bv"]]).reshape(1, -1))
        wfc = p["Wfc"].reshape(H, D, d)
        wfcp.append(wfc[:, :pd, :].reshape(H * pd, d))                      # pos rows
        wfcf.append(wfc[:, pd:, :].reshape(H * hd, d))                      # feat rows
        bfc.append(p["bfc"].reshape(1, d))
        ln_g.append(p["ln_g"].reshape(1, d))
        ln_b.append(p["ln_b"].reshape(1, d))
        W1.append(p["W1"]); b1.append(p["b1"].reshape(1, -1))
        W2.append(p["W2"]); b2.append(p["b2"].reshape(1, -1))

    kp.update(Wqkv=jnp.stack(wqkv), bqkv=jnp.stack(bqkv),
              Wfc_p=jnp.stack(wfcp), Wfc_f=jnp.stack(wfcf), bfc=jnp.stack(bfc),
              ln_g=jnp.stack(ln_g), ln_b=jnp.stack(ln_b),
              W1=jnp.stack(W1), b1=jnp.stack(b1),
              W2=jnp.stack(W2), b2=jnp.stack(b2))
    return kp


# ---------------------------------------------------------------------------
# Pure-JAX reference (torch-style layout; mirrors the bf16-operand MXU convention)
# ---------------------------------------------------------------------------
def ref_decoder_layer(x, pos, p, cfg):
    B, N, d = x.shape
    H = cfg["n_head"]
    pd = cfg["pos_dim"]
    hd = d // H
    eps = cfg["eps"]
    xf = x.reshape(B * N, d)
    q = _mm(xf, p["Wq"]) + p["bq"]
    k = _mm(xf, p["Wk"]) + p["bk"]
    v = _mm(xf, p["Wv"]) + p["bv"]

    def heads(t):
        return t.reshape(B, N, H, hd).transpose(0, 2, 1, 3)   # (B, H, N, hd)

    q, k, v = heads(q), heads(k), heads(v)
    posr = jnp.broadcast_to(pos[:, None, :, :], (B, H, N, pd))
    q = jnp.concatenate([posr, q], axis=-1)
    k = jnp.concatenate([posr, k], axis=-1)
    v = jnp.concatenate([posr, v], axis=-1)
    D = hd + pd
    kv = jnp.einsum("bhnd,bhne->bhde", k.astype(_BF16), v.astype(_BF16),
                    preferred_element_type=_F32) / N
    att = jnp.einsum("bhnd,bhde->bhne", q.astype(_BF16), kv.astype(_BF16),
                     preferred_element_type=_F32)
    att = att.transpose(0, 2, 1, 3).reshape(B * N, H * D)
    att_out = _mm(att, p["Wfc"]) + p["bfc"]

    z = xf + att_out
    mean = jnp.mean(z, axis=-1, keepdims=True)
    zc = z - mean
    var = jnp.mean(zc * zc, axis=-1, keepdims=True)
    x1 = zc * lax.rsqrt(var + eps) * p["ln_g"] + p["ln_b"]

    h1 = _act(_mm(x1, p["W1"]) + p["b1"], cfg["activation"])
    out = x1 + _mm(h1, p["W2"]) + p["b2"]
    return out.reshape(B, N, d)


def ref_forward(x, pos, params, cfg):
    B, N, _ = x.shape
    d = cfg["n_hidden"]
    h = _mm(x.reshape(B * N, -1), params["Wft"]) + params["bft"]
    h = h.reshape(B, N, d)
    for p in params["layers"]:
        h = ref_decoder_layer(h, pos, p, cfg)
    hf = h.reshape(B * N, d)
    r = _act(_mm(hf, params["Wr1"]) + params["br1"], cfg["activation"])
    r = _mm(r, params["Wr2"]) + params["br2"]
    return r.reshape(B, N, cfg["out_dim"])


# ---------------------------------------------------------------------------
# Deterministic parameter init (shapes follow the module's __init__)
# ---------------------------------------------------------------------------
def init_params(key, cfg):
    d = cfg["n_hidden"]
    H = cfg["n_head"]
    pd = cfg["pos_dim"]
    dff = cfg["dim_feedforward"]
    keys = iter(jax.random.split(key, 64))

    def lin(din, dout):
        w = jax.random.normal(next(keys), (din, dout), jnp.float32) / np.sqrt(din)
        b = jax.random.normal(next(keys), (dout,), jnp.float32) * 0.01
        return w, b

    params = {}
    params["Wft"], params["bft"] = lin(cfg["in_dim"], d)          # feature_transform
    layers = []
    for _ in range(cfg["num_layers"] - 1):
        p = {}
        p["Wq"], p["bq"] = lin(d, d)
        p["Wk"], p["bk"] = lin(d, d)
        p["Wv"], p["bv"] = lin(d, d)
        p["Wfc"], p["bfc"] = lin(d + H * pd, d)                   # attention output fc
        p["ln_g"] = jnp.ones((d,), jnp.float32)
        p["ln_b"] = jnp.zeros((d,), jnp.float32)
        p["W1"], p["b1"] = lin(d, dff)                            # FeedForward.lr1
        p["W2"], p["b2"] = lin(dff, d)                            # FeedForward.lr2
        layers.append(p)
    params["layers"] = layers
    params["Wr1"], params["br1"] = lin(d, dff)                    # regressor[0]
    params["Wr2"], params["br2"] = lin(dff, cfg["out_dim"])       # regressor[2]
    return params


# ---------------------------------------------------------------------------
if __name__ == "__main__":
    cfg = dict(in_dim=6, n_hidden=32, n_head=2, out_dim=1, num_layers=2,
               dim_feedforward=64, pos_dim=2, activation="silu", eps=1e-5)
    B, N = 2, 64

    key = jax.random.PRNGKey(0)
    kx, kp_, kw = jax.random.split(key, 3)
    x = jax.random.normal(kx, (B, N, cfg["in_dim"]), jnp.float32)
    pos = jax.random.uniform(kp_, (B, N, cfg["pos_dim"]), jnp.float32)
    params = init_params(kw, cfg)
    kparams = prepare_kernel_params(params, cfg)   # one-time weight re-layout

    fwd = jax.jit(functools.partial(pallas_forward, cfg=cfg))
    out = jax.block_until_ready(fwd(x, pos, kparams))

    ref = jax.block_until_ready(ref_forward(x, pos, params, cfg))

    assert out.shape == (B, N, cfg["out_dim"])
    # The reference mirrors the kernel's bf16-operand / f32-accumulate MXU
    # convention; the folded-Wfc algebra reorders f32 summations, so allow a
    # ~1e-2 tolerance (well below any algebra error, well above bf16 reordering noise).
    np.testing.assert_allclose(np.asarray(out), np.asarray(ref), rtol=1e-2, atol=2e-2)
    print("KERNEL_OK")
</pallas_src>

<mosaic_0001>
module attributes {stable_mosaic.version = 11 : i64} {
  func.func @_fused_forward_kernel(%arg0: i32, %arg1: memref<1x64x6xf32, #tpu.memory_space<vmem>>, %arg2: memref<1x64x2xf32, #tpu.memory_space<vmem>>, %arg3: memref<6x32xf32, #tpu.memory_space<vmem>>, %arg4: memref<1x32xf32, #tpu.memory_space<vmem>>, %arg5: memref<1x32x96xf32, #tpu.memory_space<vmem>>, %arg6: memref<1x1x96xf32, #tpu.memory_space<vmem>>, %arg7: memref<1x4x32xf32, #tpu.memory_space<vmem>>, %arg8: memref<1x32x32xf32, #tpu.memory_space<vmem>>, %arg9: memref<1x1x32xf32, #tpu.memory_space<vmem>>, %arg10: memref<1x1x32xf32, #tpu.memory_space<vmem>>, %arg11: memref<1x1x32xf32, #tpu.memory_space<vmem>>, %arg12: memref<1x32x64xf32, #tpu.memory_space<vmem>>, %arg13: memref<1x1x64xf32, #tpu.memory_space<vmem>>, %arg14: memref<1x64x32xf32, #tpu.memory_space<vmem>>, %arg15: memref<1x1x32xf32, #tpu.memory_space<vmem>>, %arg16: memref<32x64xf32, #tpu.memory_space<vmem>>, %arg17: memref<1x64xf32, #tpu.memory_space<vmem>>, %arg18: memref<1x64xf32, #tpu.memory_space<vmem>>, %arg19: memref<1x1xf32, #tpu.memory_space<vmem>>, %arg20: memref<1x64x1xf32, #tpu.memory_space<vmem>>) attributes {dimension_semantics = [#tpu.dimension_semantics<parallel>], iteration_bounds = array<i64: 2>, scalar_prefetch = 0 : i64, scratch_operands = 0 : i64, tpu.core_type = #tpu.core_type<tc>, window_params = [{transform_indices = @transform_0, window_bounds = array<i64: 1, 64, 6>}, {transform_indices = @transform_1, window_bounds = array<i64: 1, 64, 2>}, {pipeline_mode = #tpu.pipeline_mode<synchronous>, transform_indices = @transform_2, window_bounds = array<i64: 6, 32>}, {pipeline_mode = #tpu.pipeline_mode<synchronous>, transform_indices = @transform_3, window_bounds = array<i64: 1, 32>}, {pipeline_mode = #tpu.pipeline_mode<synchronous>, transform_indices = @transform_4, window_bounds = array<i64: 1, 32, 96>}, {pipeline_mode = #tpu.pipeline_mode<synchronous>, transform_indices = @transform_5, window_bounds = array<i64: 1, 1, 96>}, {pipeline_mode = #tpu.pipeline_mode<synchronous>, transform_indices = @transform_6, window_bounds = array<i64: 1, 4, 32>}, {pipeline_mode = #tpu.pipeline_mode<synchronous>, transform_indices = @transform_7, window_bounds = array<i64: 1, 32, 32>}, {pipeline_mode = #tpu.pipeline_mode<synchronous>, transform_indices = @transform_8, window_bounds = array<i64: 1, 1, 32>}, {pipeline_mode = #tpu.pipeline_mode<synchronous>, transform_indices = @transform_9, window_bounds = array<i64: 1, 1, 32>}, {pipeline_mode = #tpu.pipeline_mode<synchronous>, transform_indices = @transform_10, window_bounds = array<i64: 1, 1, 32>}, {pipeline_mode = #tpu.pipeline_mode<synchronous>, transform_indices = @transform_11, window_bounds = array<i64: 1, 32, 64>}, {pipeline_mode = #tpu.pipeline_mode<synchronous>, transform_indices = @transform_12, window_bounds = array<i64: 1, 1, 64>}, {pipeline_mode = #tpu.pipeline_mode<synchronous>, transform_indices = @transform_13, window_bounds = array<i64: 1, 64, 32>}, {pipeline_mode = #tpu.pipeline_mode<synchronous>, transform_indices = @transform_14, window_bounds = array<i64: 1, 1, 32>}, {pipeline_mode = #tpu.pipeline_mode<synchronous>, transform_indices = @transform_15, window_bounds = array<i64: 32, 64>}, {pipeline_mode = #tpu.pipeline_mode<synchronous>, transform_indices = @transform_16, window_bounds = array<i64: 1, 64>}, {pipeline_mode = #tpu.pipeline_mode<synchronous>, transform_indices = @transform_17, window_bounds = array<i64: 1, 64>}, {pipeline_mode = #tpu.pipeline_mode<synchronous>, transform_indices = @transform_18, window_bounds = array<i64: 1, 1>}, {transform_indices = @transform_19, window_bounds = array<i64: 1, 64, 1>}]} {
    %c0 = arith.constant 0 : index
    %c0_0 = arith.constant 0 : index
    %c0_1 = arith.constant 0 : index
    %0 = vector.load %arg1[%c0, %c0_0, %c0_1] : memref<1x64x6xf32, #tpu.memory_space<vmem>>, vector<1x64x6xf32>
    %1 = vector.shape_cast %0 : vector<1x64x6xf32> to vector<64x6xf32>
    %2 = arith.truncf %1 : vector<64x6xf32> to vector<64x6xbf16>
    %c0_2 = arith.constant 0 : index
    %c0_3 = arith.constant 0 : index
    %c0_4 = arith.constant 0 : index
    %3 = vector.load %arg2[%c0_2, %c0_3, %c0_4] : memref<1x64x2xf32, #tpu.memory_space<vmem>>, vector<1x64x2xf32>
    %4 = vector.shape_cast %3 : vector<1x64x2xf32> to vector<64x2xf32>
    %5 = arith.truncf %4 : vector<64x2xf32> to vector<64x2xbf16>
    %c0_5 = arith.constant 0 : index
    %c0_6 = arith.constant 0 : index
    %6 = vector.load %arg3[%c0_5, %c0_6] : memref<6x32xf32, #tpu.memory_space<vmem>>, vector<6x32xf32>
    %7 = arith.truncf %6 : vector<6x32xf32> to vector<6x32xbf16>
    %cst = arith.constant dense<0.000000e+00> : vector<64x32xf32>
    %8 = tpu.matmul %2, %7, %cst {dimension_numbers = #tpu.dot_dimension_numbers<[1], [0], [0], [1], [0, 0, 1, 1], [], []>} : vector<64x6xbf16>, vector<6x32xbf16>, vector<64x32xf32> -> vector<64x32xf32>
    %c0_7 = arith.constant 0 : index
    %c0_8 = arith.constant 0 : index
    %9 = vector.load %arg4[%c0_7, %c0_8] : memref<1x32xf32, #tpu.memory_space<vmem>>, vector<1x32xf32>
    %10 = vector.broadcast %9 : vector<1x32xf32> to vector<64x32xf32>
    %11 = arith.addf %8, %10 : vector<64x32xf32>
    %cst_9 = arith.constant dense<0.000000e+00> : vector<2x2xf32>
    %12 = tpu.matmul %5, %5, %cst_9 {dimension_numbers = #tpu.dot_dimension_numbers<[0], [0], [1], [1], [0, 1, 1, 1], [], []>} : vector<64x2xbf16>, vector<64x2xbf16>, vector<2x2xf32> -> vector<2x2xf32>
    %cst_10 = arith.constant 1.562500e-02 : f32
    %13 = vector.broadcast %cst_10 : f32 to vector<2x2xf32>
    %14 = arith.mulf %12, %13 : vector<2x2xf32>
    %15 = arith.truncf %11 : vector<64x32xf32> to vector<64x32xbf16>
    %c0_11 = arith.constant 0 : index
    %c0_12 = arith.constant 0 : index
    %c0_13 = arith.constant 0 : index
    %16 = vector.load %arg5[%c0_11, %c0_12, %c0_13] : memref<1x32x96xf32, #tpu.memory_space<vmem>>, vector<1x32x96xf32>
    %17 = vector.shape_cast %16 : vector<1x32x96xf32> to vector<32x96xf32>
    %18 = arith.truncf %17 : vector<32x96xf32> to vector<32x96xbf16>
    %cst_14 = arith.constant dense<0.000000e+00> : vector<64x96xf32>
    %19 = tpu.matmul %15, %18, %cst_14 {dimension_numbers = #tpu.dot_dimension_numbers<[1], [0], [0], [1], [0, 0, 1, 1], [], []>} : vector<64x32xbf16>, vector<32x96xbf16>, vector<64x96xf32> -> vector<64x96xf32>
    %c0_15 = arith.constant 0 : index
    %c0_16 = arith.constant 0 : index
    %c0_17 = arith.constant 0 : index
    %20 = vector.load %arg6[%c0_15, %c0_16, %c0_17] : memref<1x1x96xf32, #tpu.memory_space<vmem>>, vector<1x1x96xf32>
    %21 = vector.shape_cast %20 : vector<1x1x96xf32> to vector<1x96xf32>
    %22 = vector.broadcast %21 : vector<1x96xf32> to vector<64x96xf32>
    %23 = arith.addf %19, %22 : vector<64x96xf32>
    %24 = arith.truncf %23 : vector<64x96xf32> to vector<64x96xbf16>
    %c0_18 = arith.constant 0 : index
    %c0_19 = arith.constant 0 : index
    %c0_20 = arith.constant 0 : index
    %25 = vector.load %arg7[%c0_18, %c0_19, %c0_20] : memref<1x4x32xf32, #tpu.memory_space<vmem>>, vector<1x4x32xf32>
    %26 = vector.shape_cast %25 : vector<1x4x32xf32> to vector<4x32xf32>
    %c0_21 = arith.constant 0 : index
    %c0_22 = arith.constant 0 : index
    %c0_23 = arith.constant 0 : index
    %27 = vector.load %arg8[%c0_21, %c0_22, %c0_23] : memref<1x32x32xf32, #tpu.memory_space<vmem>>, vector<1x32x32xf32>
    %28 = vector.shape_cast %27 : vector<1x32x32xf32> to vector<32x32xf32>
    %29 = arith.truncf %28 : vector<32x32xf32> to vector<32x32xbf16>
    %30 = vector.extract_strided_slice %26 {offsets = [0, 0], sizes = [2, 32], strides = [1, 1]} : vector<4x32xf32> to vector<2x32xf32>
    %31 = vector.extract_strided_slice %26 {offsets = [2, 0], sizes = [2, 32], strides = [1, 1]} : vector<4x32xf32> to vector<2x32xf32>
    %32 = arith.addf %30, %31 : vector<2x32xf32>
    %33 = vector.extract_strided_slice %24 {offsets = [0, 64], sizes = [64, 32], strides = [1, 1]} : vector<64x96xbf16> to vector<64x32xbf16>
    %cst_24 = arith.constant dense<0.000000e+00> : vector<2x32xf32>
    %34 = tpu.matmul %5, %33, %cst_24 {dimension_numbers = #tpu.dot_dimension_numbers<[0], [0], [1], [1], [0, 1, 1, 1], [], []>} : vector<64x2xbf16>, vector<64x32xbf16>, vector<2x32xf32> -> vector<2x32xf32>
    %cst_25 = arith.constant 1.562500e-02 : f32
    %35 = vector.broadcast %cst_25 : f32 to vector<2x32xf32>
    %36 = arith.mulf %34, %35 : vector<2x32xf32>
    %37 = vector.extract_strided_slice %14 {offsets = [0, 0], sizes = [2, 1], strides = [1, 1]} : vector<2x2xf32> to vector<2x1xf32>
    %38 = vector.extract_strided_slice %32 {offsets = [0, 0], sizes = [1, 32], strides = [1, 1]} : vector<2x32xf32> to vector<1x32xf32>
    %39 = vector.broadcast %37 : vector<2x1xf32> to vector<2x32xf32>
    %40 = vector.broadcast %38 : vector<1x32xf32> to vector<2x32xf32>
    %41 = arith.mulf %39, %40 : vector<2x32xf32>
    %42 = vector.extract_strided_slice %14 {offsets = [0, 1], sizes = [2, 1], strides = [1, 1]} : vector<2x2xf32> to vector<2x1xf32>
    %43 = vector.extract_strided_slice %32 {offsets = [1, 0], sizes = [1, 32], strides = [1, 1]} : vector<2x32xf32> to vector<1x32xf32>
    %44 = vector.broadcast %42 : vector<2x1xf32> to vector<2x32xf32>
    %45 = vector.broadcast %43 : vector<1x32xf32> to vector<2x32xf32>
    %46 = arith.mulf %44, %45 : vector<2x32xf32>
    %47 = arith.addf %41, %46 : vector<2x32xf32>
    %48 = arith.truncf %36 : vector<2x32xf32> to vector<2x32xbf16>
    %cst_26 = arith.constant dense<0.000000e+00> : vector<2x32xf32>
    %49 = tpu.matmul %48, %29, %cst_26 {dimension_numbers = #tpu.dot_dimension_numbers<[1], [0], [0], [1], [0, 0, 1, 1], [], []>} : vector<2x32xbf16>, vector<32x32xbf16>, vector<2x32xf32> -> vector<2x32xf32>
    %50 = arith.addf %47, %49 : vector<2x32xf32>
    %51 = vector.extract_strided_slice %4 {offsets = [0, 0], sizes = [64, 1], strides = [1, 1]} : vector<64x2xf32> to vector<64x1xf32>
    %52 = vector.extract_strided_slice %50 {offsets = [0, 0], sizes = [1, 32], strides = [1, 1]} : vector<2x32xf32> to vector<1x32xf32>
    %53 = vector.broadcast %51 : vector<64x1xf32> to vector<64x32xf32>
    %54 = vector.broadcast %52 : vector<1x32xf32> to vector<64x32xf32>
    %55 = arith.mulf %53, %54 : vector<64x32xf32>
    %56 = vector.extract_strided_slice %4 {offsets = [0, 1], sizes = [64, 1], strides = [1, 1]} : vector<64x2xf32> to vector<64x1xf32>
    %57 = vector.extract_strided_slice %50 {offsets = [1, 0], sizes = [1, 32], strides = [1, 1]} : vector<2x32xf32> to vector<1x32xf32>
    %58 = vector.broadcast %56 : vector<64x1xf32> to vector<64x32xf32>
    %59 = vector.broadcast %57 : vector<1x32xf32> to vector<64x32xf32>
    %60 = arith.mulf %58, %59 : vector<64x32xf32>
    %61 = arith.addf %55, %60 : vector<64x32xf32>
    %c0_27 = arith.constant 0 : index
    %c0_28 = arith.constant 0 : index
    %c0_29 = arith.constant 0 : index
    %62 = vector.load %arg9[%c0_27, %c0_28, %c0_29] : memref<1x1x32xf32, #tpu.memory_space<vmem>>, vector<1x1x32xf32>
    %63 = vector.shape_cast %62 : vector<1x1x32xf32> to vector<1x32xf32>
    %64 = vector.broadcast %63 : vector<1x32xf32> to vector<64x32xf32>
    %65 = arith.addf %61, %64 : vector<64x32xf32>
    %66 = vector.extract_strided_slice %24 {offsets = [0, 0], sizes = [64, 16], strides = [1, 1]} : vector<64x96xbf16> to vector<64x16xbf16>
    %67 = vector.extract_strided_slice %24 {offsets = [0, 32], sizes = [64, 16], strides = [1, 1]} : vector<64x96xbf16> to vector<64x16xbf16>
    %68 = vector.extract_strided_slice %24 {offsets = [0, 64], sizes = [64, 16], strides = [1, 1]} : vector<64x96xbf16> to vector<64x16xbf16>
    %69 = vector.extract_strided_slice %26 {offsets = [0, 0], sizes = [2, 32], strides = [1, 1]} : vector<4x32xf32> to vector<2x32xf32>
    %70 = vector.extract_strided_slice %29 {offsets = [0, 0], sizes = [16, 32], strides = [1, 1]} : vector<32x32xbf16> to vector<16x32xbf16>
    %cst_30 = arith.constant dense<0.000000e+00> : vector<16x2xf32>
    %71 = tpu.matmul %67, %5, %cst_30 {dimension_numbers = #tpu.dot_dimension_numbers<[0], [0], [1], [1], [0, 1, 1, 1], [], []>} : vector<64x16xbf16>, vector<64x2xbf16>, vector<16x2xf32> -> vector<16x2xf32>
    %cst_31 = arith.constant 1.562500e-02 : f32
    %72 = vector.broadcast %cst_31 : f32 to vector<16x2xf32>
    %73 = arith.mulf %71, %72 : vector<16x2xf32>
    %cst_32 = arith.constant dense<0.000000e+00> : vector<16x16xf32>
    %74 = tpu.matmul %67, %68, %cst_32 {dimension_numbers = #tpu.dot_dimension_numbers<[0], [0], [1], [1], [0, 1, 1, 1], [], []>} : vector<64x16xbf16>, vector<64x16xbf16>, vector<16x16xf32> -> vector<16x16xf32>
    %cst_33 = arith.constant 1.562500e-02 : f32
    %75 = vector.broadcast %cst_33 : f32 to vector<16x16xf32>
    %76 = arith.mulf %74, %75 : vector<16x16xf32>
    %77 = vector.extract_strided_slice %73 {offsets = [0, 0], sizes = [16, 1], strides = [1, 1]} : vector<16x2xf32> to vector<16x1xf32>
    %78 = vector.extract_strided_slice %69 {offsets = [0, 0], sizes = [1, 32], strides = [1, 1]} : vector<2x32xf32> to vector<1x32xf32>
    %79 = vector.broadcast %77 : vector<16x1xf32> to vector<16x32xf32>
    %80 = vector.broadcast %78 : vector<1x32xf32> to vector<16x32xf32>
    %81 = arith.mulf %79, %80 : vector<16x32xf32>
    %82 = vector.extract_strided_slice %73 {offsets = [0, 1], sizes = [16, 1], strides = [1, 1]} : vector<16x2xf32> to vector<16x1xf32>
    %83 = vector.extract_strided_slice %69 {offsets = [1, 0], sizes = [1, 32], strides = [1, 1]} : vector<2x32xf32> to vector<1x32xf32>
    %84 = vector.broadcast %82 : vector<16x1xf32> to vector<16x32xf32>
    %85 = vector.broadcast %83 : vector<1x32xf32> to vector<16x32xf32>
    %86 = arith.mulf %84, %85 : vector<16x32xf32>
    %87 = arith.addf %81, %86 : vector<16x32xf32>
    %88 = arith.truncf %76 : vector<16x16xf32> to vector<16x16xbf16>
    %cst_34 = arith.constant dense<0.000000e+00> : vector<16x32xf32>
    %89 = tpu.matmul %88, %70, %cst_34 {dimension_numbers = #tpu.dot_dimension_numbers<[1], [0], [0], [1], [0, 0, 1, 1], [], []>} : vector<16x16xbf16>, vector<16x32xbf16>, vector<16x32xf32> -> vector<16x32xf32>
    %90 = arith.addf %87, %89 : vector<16x32xf32>
    %91 = arith.truncf %90 : vector<16x32xf32> to vector<16x32xbf16>
    %cst_35 = arith.constant dense<0.000000e+00> : vector<64x32xf32>
    %92 = tpu.matmul %66, %91, %cst_35 {dimension_numbers = #tpu.dot_dimension_numbers<[1], [0], [0], [1], [0, 0, 1, 1], [], []>} : vector<64x16xbf16>, vector<16x32xbf16>, vector<64x32xf32> -> vector<64x32xf32>
    %93 = arith.addf %65, %92 : vector<64x32xf32>
    %94 = vector.extract_strided_slice %24 {offsets = [0, 16], sizes = [64, 16], strides = [1, 1]} : vector<64x96xbf16> to vector<64x16xbf16>
    %95 = vector.extract_strided_slice %24 {offsets = [0, 48], sizes = [64, 16], strides = [1, 1]} : vector<64x96xbf16> to vector<64x16xbf16>
    %96 = vector.extract_strided_slice %24 {offsets = [0, 80], sizes = [64, 16], strides = [1, 1]} : vector<64x96xbf16> to vector<64x16xbf16>
    %97 = vector.extract_strided_slice %26 {offsets = [2, 0], sizes = [2, 32], strides = [1, 1]} : vector<4x32xf32> to vector<2x32xf32>
    %98 = vector.extract_strided_slice %29 {offsets = [16, 0], sizes = [16, 32], strides = [1, 1]} : vector<32x32xbf16> to vector<16x32xbf16>
    %cst_36 = arith.constant dense<0.000000e+00> : vector<16x2xf32>
    %99 = tpu.matmul %95, %5, %cst_36 {dimension_numbers = #tpu.dot_dimension_numbers<[0], [0], [1], [1], [0, 1, 1, 1], [], []>} : vector<64x16xbf16>, vector<64x2xbf16>, vector<16x2xf32> -> vector<16x2xf32>
    %cst_37 = arith.constant 1.562500e-02 : f32
    %100 = vector.broadcast %cst_37 : f32 to vector<16x2xf32>
    %101 = arith.mulf %99, %100 : vector<16x2xf32>
    %cst_38 = arith.constant dense<0.000000e+00> : vector<16x16xf32>
    %102 = tpu.matmul %95, %96, %cst_38 {dimension_numbers = #tpu.dot_dimension_numbers<[0], [0], [1], [1], [0, 1, 1, 1], [], []>} : vector<64x16xbf16>, vector<64x16xbf16>, vector<16x16xf32> -> vector<16x16xf32>
    %cst_39 = arith.constant 1.562500e-02 : f32
    %103 = vector.broadcast %cst_39 : f32 to vector<16x16xf32>
    %104 = arith.mulf %102, %103 : vector<16x16xf32>
    %105 = vector.extract_strided_slice %101 {offsets = [0, 0], sizes = [16, 1], strides = [1, 1]} : vector<16x2xf32> to vector<16x1xf32>
    %106 = vector.extract_strided_slice %97 {offsets = [0, 0], sizes = [1, 32], strides = [1, 1]} : vector<2x32xf32> to vector<1x32xf32>
    %107 = vector.broadcast %105 : vector<16x1xf32> to vector<16x32xf32>
    %108 = vector.broadcast %106 : vector<1x32xf32> to vector<16x32xf32>
    %109 = arith.mulf %107, %108 : vector<16x32xf32>
    %110 = vector.extract_strided_slice %101 {offsets = [0, 1], sizes = [16, 1], strides = [1, 1]} : vector<16x2xf32> to vector<16x1xf32>
    %111 = vector.extract_strided_slice %97 {offsets = [1, 0], sizes = [1, 32], strides = [1, 1]} : vector<2x32xf32> to vector<1x32xf32>
    %112 = vector.broadcast %110 : vector<16x1xf32> to vector<16x32xf32>
    %113 = vector.broadcast %111 : vector<1x32xf32> to vector<16x32xf32>
    %114 = arith.mulf %112, %113 : vector<16x32xf32>
    %115 = arith.addf %109, %114 : vector<16x32xf32>
    %116 = arith.truncf %104 : vector<16x16xf32> to vector<16x16xbf16>
    %cst_40 = arith.constant dense<0.000000e+00> : vector<16x32xf32>
    %117 = tpu.matmul %116, %98, %cst_40 {dimension_numbers = #tpu.dot_dimension_numbers<[1], [0], [0], [1], [0, 0, 1, 1], [], []>} : vector<16x16xbf16>, vector<16x32xbf16>, vector<16x32xf32> -> vector<16x32xf32>
    %118 = arith.addf %115, %117 : vector<16x32xf32>
    %119 = arith.truncf %118 : vector<16x32xf32> to vector<16x32xbf16>
    %cst_41 = arith.constant dense<0.000000e+00> : vector<64x32xf32>
    %120 = tpu.matmul %94, %119, %cst_41 {dimension_numbers = #tpu.dot_dimension_numbers<[1], [0], [0], [1], [0, 0, 1, 1], [], []>} : vector<64x16xbf16>, vector<16x32xbf16>, vector<64x32xf32> -> vector<64x32xf32>
    %121 = arith.addf %93, %120 : vector<64x32xf32>
    %122 = arith.addf %11, %121 : vector<64x32xf32>
    %cst_42 = arith.constant dense<0.000000e+00> : vector<64xf32>
    %123 = vector.multi_reduction <add>, %122, %cst_42 [1] : vector<64x32xf32> to vector<64xf32>
    %124 = vector.shape_cast %123 : vector<64xf32> to vector<64x1xf32>
    %cst_43 = arith.constant 3.200000e+01 : f32
    %125 = vector.broadcast %cst_43 : f32 to vector<64x1xf32>
    %126 = arith.divf %124, %125 : vector<64x1xf32>
    %127 = vector.broadcast %126 : vector<64x1xf32> to vector<64x32xf32>
    %128 = arith.subf %122, %127 : vector<64x32xf32>
    %129 = arith.mulf %128, %128 : vector<64x32xf32>
    %cst_44 = arith.constant dense<0.000000e+00> : vector<64xf32>
    %130 = vector.multi_reduction <add>, %129, %cst_44 [1] : vector<64x32xf32> to vector<64xf32>
    %131 = vector.shape_cast %130 : vector<64xf32> to vector<64x1xf32>
    %cst_45 = arith.constant 3.200000e+01 : f32
    %132 = vector.broadcast %cst_45 : f32 to vector<64x1xf32>
    %133 = arith.divf %131, %132 : vector<64x1xf32>
    %cst_46 = arith.constant 9.99999974E-6 : f32
    %134 = vector.broadcast %cst_46 : f32 to vector<64x1xf32>
    %135 = arith.addf %133, %134 : vector<64x1xf32>
    %136 = math.rsqrt %135 : vector<64x1xf32>
    %137 = vector.broadcast %136 : vector<64x1xf32> to vector<64x32xf32>
    %138 = arith.mulf %128, %137 : vector<64x32xf32>
    %c0_47 = arith.constant 0 : index
    %c0_48 = arith.constant 0 : index
    %c0_49 = arith.constant 0 : index
    %139 = vector.load %arg10[%c0_47, %c0_48, %c0_49] : memref<1x1x32xf32, #tpu.memory_space<vmem>>, vector<1x1x32xf32>
    %140 = vector.shape_cast %139 : vector<1x1x32xf32> to vector<1x32xf32>
    %141 = vector.broadcast %140 : vector<1x32xf32> to vector<64x32xf32>
    %142 = arith.mulf %138, %141 : vector<64x32xf32>
    %c0_50 = arith.constant 0 : index
    %c0_51 = arith.constant 0 : index
    %c0_52 = arith.constant 0 : index
    %143 = vector.load %arg11[%c0_50, %c0_51, %c0_52] : memref<1x1x32xf32, #tpu.memory_space<vmem>>, vector<1x1x32xf32>
    %144 = vector.shape_cast %143 : vector<1x1x32xf32> to vector<1x32xf32>
    %145 = vector.broadcast %144 : vector<1x32xf32> to vector<64x32xf32>
    %146 = arith.addf %142, %145 : vector<64x32xf32>
    %c0_53 = arith.constant 0 : index
    %c0_54 = arith.constant 0 : index
    %c0_55 = arith.constant 0 : index
    %147 = vector.load %arg12[%c0_53, %c0_54, %c0_55] : memref<1x32x64xf32, #tpu.memory_space<vmem>>, vector<1x32x64xf32>
    %148 = vector.shape_cast %147 : vector<1x32x64xf32> to vector<32x64xf32>
    %149 = arith.truncf %146 : vector<64x32xf32> to vector<64x32xbf16>
    %150 = arith.truncf %148 : vector<32x64xf32> to vector<32x64xbf16>
    %cst_56 = arith.constant dense<0.000000e+00> : vector<64x64xf32>
    %151 = tpu.matmul %149, %150, %cst_56 {dimension_numbers = #tpu.dot_dimension_numbers<[1], [0], [0], [1], [0, 0, 1, 1], [], []>} : vector<64x32xbf16>, vector<32x64xbf16>, vector<64x64xf32> -> vector<64x64xf32>
    %c0_57 = arith.constant 0 : index
    %c0_58 = arith.constant 0 : index
    %c0_59 = arith.constant 0 : index
    %152 = vector.load %arg13[%c0_57, %c0_58, %c0_59] : memref<1x1x64xf32, #tpu.memory_space<vmem>>, vector<1x1x64xf32>
    %153 = vector.shape_cast %152 : vector<1x1x64xf32> to vector<1x64xf32>
    %154 = vector.broadcast %153 : vector<1x64xf32> to vector<64x64xf32>
    %155 = arith.addf %151, %154 : vector<64x64xf32>
    %156 = arith.negf %155 : vector<64x64xf32>
    %157 = math.exp %156 : vector<64x64xf32>
    %cst_60 = arith.constant 1.000000e+00 : f32
    %158 = vector.broadcast %cst_60 : f32 to vector<64x64xf32>
    %159 = arith.addf %158, %157 : vector<64x64xf32>
    %160 = arith.divf %158, %159 : vector<64x64xf32>
    %161 = arith.mulf %155, %160 : vector<64x64xf32>
    %c0_61 = arith.constant 0 : index
    %c0_62 = arith.constant 0 : index
    %c0_63 = arith.constant 0 : index
    %162 = vector.load %arg14[%c0_61, %c0_62, %c0_63] : memref<1x64x32xf32, #tpu.memory_space<vmem>>, vector<1x64x32xf32>
    %163 = vector.shape_cast %162 : vector<1x64x32xf32> to vector<64x32xf32>
    %164 = arith.truncf %161 : vector<64x64xf32> to vector<64x64xbf16>
    %165 = arith.truncf %163 : vector<64x32xf32> to vector<64x32xbf16>
    %cst_64 = arith.constant dense<0.000000e+00> : vector<64x32xf32>
    %166 = tpu.matmul %164, %165, %cst_64 {dimension_numbers = #tpu.dot_dimension_numbers<[1], [0], [0], [1], [0, 0, 1, 1], [], []>} : vector<64x64xbf16>, vector<64x32xbf16>, vector<64x32xf32> -> vector<64x32xf32>
    %167 = arith.addf %146, %166 : vector<64x32xf32>
    %c0_65 = arith.constant 0 : index
    %c0_66 = arith.constant 0 : index
    %c0_67 = arith.constant 0 : index
    %168 = vector.load %arg15[%c0_65, %c0_66, %c0_67] : memref<1x1x32xf32, #tpu.memory_space<vmem>>, vector<1x1x32xf32>
    %169 = vector.shape_cast %168 : vector<1x1x32xf32> to vector<1x32xf32>
    %170 = vector.broadcast %169 : vector<1x32xf32> to vector<64x32xf32>
    %171 = arith.addf %167, %170 : vector<64x32xf32>
    %c0_68 = arith.constant 0 : index
    %c0_69 = arith.constant 0 : index
    %172 = vector.load %arg16[%c0_68, %c0_69] : memref<32x64xf32, #tpu.memory_space<vmem>>, vector<32x64xf32>
    %173 = arith.truncf %171 : vector<64x32xf32> to vector<64x32xbf16>
    %174 = arith.truncf %172 : vector<32x64xf32> to vector<32x64xbf16>
    %cst_70 = arith.constant dense<0.000000e+00> : vector<64x64xf32>
    %175 = tpu.matmul %173, %174, %cst_70 {dimension_numbers = #tpu.dot_dimension_numbers<[1], [0], [0], [1], [0, 0, 1, 1], [], []>} : vector<64x32xbf16>, vector<32x64xbf16>, vector<64x64xf32> -> vector<64x64xf32>
    %c0_71 = arith.constant 0 : index
    %c0_72 = arith.constant 0 : index
    %176 = vector.load %arg17[%c0_71, %c0_72] : memref<1x64xf32, #tpu.memory_space<vmem>>, vector<1x64xf32>
    %177 = vector.broadcast %176 : vector<1x64xf32> to vector<64x64xf32>
    %178 = arith.addf %175, %177 : vector<64x64xf32>
    %179 = arith.negf %178 : vector<64x64xf32>
    %180 = math.exp %179 : vector<64x64xf32>
    %cst_73 = arith.constant 1.000000e+00 : f32
    %181 = vector.broadcast %cst_73 : f32 to vector<64x64xf32>
    %182 = arith.addf %181, %180 : vector<64x64xf32>
    %183 = arith.divf %181, %182 : vector<64x64xf32>
    %184 = arith.mulf %178, %183 : vector<64x64xf32>
    %c0_74 = arith.constant 0 : index
    %c0_75 = arith.constant 0 : index
    %185 = vector.load %arg18[%c0_74, %c0_75] : memref<1x64xf32, #tpu.memory_space<vmem>>, vector<1x64xf32>
    %186 = arith.truncf %185 : vector<1x64xf32> to vector<1x64xbf16>
    %187 = arith.extf %186 : vector<1x64xbf16> to vector<1x64xf32>
    %188 = arith.truncf %184 : vector<64x64xf32> to vector<64x64xbf16>
    %189 = arith.extf %188 : vector<64x64xbf16> to vector<64x64xf32>
    %190 = vector.broadcast %187 : vector<1x64xf32> to vector<64x64xf32>
    %191 = arith.mulf %189, %190 : vector<64x64xf32>
    %cst_76 = arith.constant dense<0.000000e+00> : vector<64xf32>
    %192 = vector.multi_reduction <add>, %191, %cst_76 [1] : vector<64x64xf32> to vector<64xf32>
    %193 = vector.shape_cast %192 : vector<64xf32> to vector<64x1xf32>
    %c0_77 = arith.constant 0 : index
    %c0_78 = arith.constant 0 : index
    %194 = vector.load %arg19[%c0_77, %c0_78] : memref<1x1xf32, #tpu.memory_space<vmem>>, vector<1x1xf32>
    %195 = vector.broadcast %194 : vector<1x1xf32> to vector<64x1xf32>
    %196 = arith.addf %193, %195 : vector<64x1xf32>
    %c0_79 = arith.constant 0 : index
    %c0_80 = arith.constant 0 : index
    %c0_81 = arith.constant 0 : index
    %197 = vector.load %arg20[%c0_79, %c0_80, %c0_81] : memref<1x64x1xf32, #tpu.memory_space<vmem>>, vector<1x64x1xf32>
    %198 = vector.shape_cast %197 : vector<1x64x1xf32> to vector<64x1xf32>
    %199 = vector.shape_cast %196 : vector<64x1xf32> to vector<1x64x1xf32>
    tpu.vector_store %arg20[%c0_79, %c0_80, %c0_81], %199 {strides = array<i32>} : memref<1x64x1xf32, #tpu.memory_space<vmem>>, vector<1x64x1xf32>,
    return
  }
  func.func @transform_0(%arg0: i32) -> (i32, i32, i32) {
    %c0_i32 = arith.constant 0 : i32
    %c0_i32_0 = arith.constant 0 : i32
    %c0_i32_1 = arith.constant 0 : i32
    return %arg0, %c0_i32, %c0_i32_0 : i32, i32, i32
  }
  func.func @transform_1(%arg0: i32) -> (i32, i32, i32) {
    %c0_i32 = arith.constant 0 : i32
    %c0_i32_0 = arith.constant 0 : i32
    %c0_i32_1 = arith.constant 0 : i32
    return %arg0, %c0_i32, %c0_i32_0 : i32, i32, i32
  }
  func.func @transform_2(%arg0: i32) -> (i32, i32) {
    %c0_i32 = arith.constant 0 : i32
    %c0_i32_0 = arith.constant 0 : i32
    %c0_i32_1 = arith.constant 0 : i32
    return %c0_i32, %c0_i32_0 : i32, i32
  }
  func.func @transform_3(%arg0: i32) -> (i32, i32) {
    %c0_i32 = arith.constant 0 : i32
    %c0_i32_0 = arith.constant 0 : i32
    %c0_i32_1 = arith.constant 0 : i32
    return %c0_i32, %c0_i32_0 : i32, i32
  }
  func.func @transform_4(%arg0: i32) -> (i32, i32, i32) {
    %c0_i32 = arith.constant 0 : i32
    %c0_i32_0 = arith.constant 0 : i32
    %c0_i32_1 = arith.constant 0 : i32
    %c0_i32_2 = arith.constant 0 : i32
    return %c0_i32, %c0_i32_0, %c0_i32_1 : i32, i32, i32
  }
  func.func @transform_5(%arg0: i32) -> (i32, i32, i32) {
    %c0_i32 = arith.constant 0 : i32
    %c0_i32_0 = arith.constant 0 : i32
    %c0_i32_1 = arith.constant 0 : i32
    %c0_i32_2 = arith.constant 0 : i32
    return %c0_i32, %c0_i32_0, %c0_i32_1 : i32, i32, i32
  }
  func.func @transform_6(%arg0: i32) -> (i32, i32, i32) {
    %c0_i32 = arith.constant 0 : i32
    %c0_i32_0 = arith.constant 0 : i32
    %c0_i32_1 = arith.constant 0 : i32
    %c0_i32_2 = arith.constant 0 : i32
    return %c0_i32, %c0_i32_0, %c0_i32_1 : i32, i32, i32
  }
  func.func @transform_7(%arg0: i32) -> (i32, i32, i32) {
    %c0_i32 = arith.constant 0 : i32
    %c0_i32_0 = arith.constant 0 : i32
    %c0_i32_1 = arith.constant 0 : i32
    %c0_i32_2 = arith.constant 0 : i32
    return %c0_i32, %c0_i32_0, %c0_i32_1 : i32, i32, i32
  }
  func.func @transform_8(%arg0: i32) -> (i32, i32, i32) {
    %c0_i32 = arith.constant 0 : i32
    %c0_i32_0 = arith.constant 0 : i32
    %c0_i32_1 = arith.constant 0 : i32
    %c0_i32_2 = arith.constant 0 : i32
    return %c0_i32, %c0_i32_0, %c0_i32_1 : i32, i32, i32
  }
  func.func @transform_9(%arg0: i32) -> (i32, i32, i32) {
    %c0_i32 = arith.constant 0 : i32
    %c0_i32_0 = arith.constant 0 : i32
    %c0_i32_1 = arith.constant 0 : i32
    %c0_i32_2 = arith.constant 0 : i32
    return %c0_i32, %c0_i32_0, %c0_i32_1 : i32, i32, i32
  }
  func.func @transform_10(%arg0: i32) -> (i32, i32, i32) {
    %c0_i32 = arith.constant 0 : i32
    %c0_i32_0 = arith.constant 0 : i32
    %c0_i32_1 = arith.constant 0 : i32
    %c0_i32_2 = arith.constant 0 : i32
    return %c0_i32, %c0_i32_0, %c0_i32_1 : i32, i32, i32
  }
  func.func @transform_11(%arg0: i32) -> (i32, i32, i32) {
    %c0_i32 = arith.constant 0 : i32
    %c0_i32_0 = arith.constant 0 : i32
    %c0_i32_1 = arith.constant 0 : i32
    %c0_i32_2 = arith.constant 0 : i32
    return %c0_i32, %c0_i32_0, %c0_i32_1 : i32, i32, i32
  }
  func.func @transform_12(%arg0: i32) -> (i32, i32, i32) {
    %c0_i32 = arith.constant 0 : i32
    %c0_i32_0 = arith.constant 0 : i32
    %c0_i32_1 = arith.constant 0 : i32
    %c0_i32_2 = arith.constant 0 : i32
    return %c0_i32, %c0_i32_0, %c0_i32_1 : i32, i32, i32
  }
  func.func @transform_13(%arg0: i32) -> (i32, i32, i32) {
    %c0_i32 = arith.constant 0 : i32
    %c0_i32_0 = arith.constant 0 : i32
    %c0_i32_1 = arith.constant 0 : i32
    %c0_i32_2 = arith.constant 0 : i32
    return %c0_i32, %c0_i32_0, %c0_i32_1 : i32, i32, i32
  }
  func.func @transform_14(%arg0: i32) -> (i32, i32, i32) {
    %c0_i32 = arith.constant 0 : i32
    %c0_i32_0 = arith.constant 0 : i32
    %c0_i32_1 = arith.constant 0 : i32
    %c0_i32_2 = arith.constant 0 : i32
    return %c0_i32, %c0_i32_0, %c0_i32_1 : i32, i32, i32
  }
  func.func @transform_15(%arg0: i32) -> (i32, i32) {
    %c0_i32 = arith.constant 0 : i32
    %c0_i32_0 = arith.constant 0 : i32
    %c0_i32_1 = arith.constant 0 : i32
    return %c0_i32, %c0_i32_0 : i32, i32
  }
  func.func @transform_16(%arg0: i32) -> (i32, i32) {
    %c0_i32 = arith.constant 0 : i32
    %c0_i32_0 = arith.constant 0 : i32
    %c0_i32_1 = arith.constant 0 : i32
    return %c0_i32, %c0_i32_0 : i32, i32
  }
  func.func @transform_17(%arg0: i32) -> (i32, i32) {
    %c0_i32 = arith.constant 0 : i32
    %c0_i32_0 = arith.constant 0 : i32
    %c0_i32_1 = arith.constant 0 : i32
    return %c0_i32, %c0_i32_0 : i32, i32
  }
  func.func @transform_18(%arg0: i32) -> (i32, i32) {
    %c0_i32 = arith.constant 0 : i32
    %c0_i32_0 = arith.constant 0 : i32
    %c0_i32_1 = arith.constant 0 : i32
    return %c0_i32, %c0_i32_0 : i32, i32
  }
  func.func @transform_19(%arg0: i32) -> (i32, i32, i32) {
    %c0_i32 = arith.constant 0 : i32
    %c0_i32_0 = arith.constant 0 : i32
    %c0_i32_1 = arith.constant 0 : i32
    return %arg0, %c0_i32, %c0_i32_0 : i32, i32, i32
  }
}

</mosaic_0001>

<bundles_post_ra>
// kernel: pallas_forward.1
= control target key start
LH: loop header
LB: loop body
LE: loop exit
PB: predicated region body
PF: predicated region fallthrough
CT: control target
= control target key end

     0   :  { %s3023_s20 = smov 0   ;;  %s3535_s0 = inlined_call_operand.vmem [shape: f32[2,64,6], index: 0, kind: input, shape index: {}]   ;;  %s3536_s1 = inlined_call_operand.vmem [shape: f32[2,64,2], index: 1, kind: input, shape index: {}]   ;;  %s3537_s2 = inlined_call_operand.vmem [shape: f32[6,32], index: 2, kind: input, shape index: {}]   ;;  %s3538_s3 = inlined_call_operand.vmem [shape: f32[1,32], index: 3, kind: input, shape index: {}]   ;;  %s3539_s4 = inlined_call_operand.vmem [shape: f32[1,32,96], index: 4, kind: input, shape index: {}]   ;;  %s3540_s5 = inlined_call_operand.vmem [shape: f32[1,1,96], index: 5, kind: input, shape index: {}]   ;;  %s3541_s6 = inlined_call_operand.vmem [shape: f32[1,4,32], index: 6, kind: input, shape index: {}]   ;;  %s3542_s7 = inlined_call_operand.vmem [shape: f32[1,32,32], index: 7, kind: input, shape index: {}]   ;;  %s3543_s8 = inlined_call_operand.vmem [shape: f32[1,1,32], index: 8, kind: input, shape index: {}]   ;;  %s3544_s9 = inlined_call_operand.vmem [shape: f32[1,1,32], index: 9, kind: input, shape index: {}]   ;;  %s3545_s10 = inlined_call_operand.vmem [shape: f32[1,1,32], index: 10, kind: input, shape index: {}]   ;;  %s3546_s11 = inlined_call_operand.vmem [shape: f32[1,32,64], index: 11, kind: input, shape index: {}]   ;;  %s3547_s12 = inlined_call_operand.vmem [shape: f32[1,1,64], index: 12, kind: input, shape index: {}]   ;;  %s3548_s13 = inlined_call_operand.vmem [shape: f32[1,64,32], index: 13, kind: input, shape index: {}]   ;;  %s3549_s14 = inlined_call_operand.vmem [shape: f32[1,1,32], index: 14, kind: input, shape index: {}]   ;;  %s3550_s15 = inlined_call_operand.vmem [shape: f32[32,64], index: 15, kind: input, shape index: {}]   ;;  %s3551_s16 = inlined_call_operand.vmem [shape: f32[1,64], index: 16, kind: input, shape index: {}]   ;;  %s3552_s17 = inlined_call_operand.vmem [shape: f32[1,64], index: 17, kind: input, shape index: {}]   ;;  %s3553_s18 = inlined_call_operand.<no memory space> [shape: f32[1,1], index: 18, kind: input, shape index: {}]   ;;  %s3554_s19 = inlined_call_operand.vmem [shape: f32[2,64,1], index: 19, kind: output, shape index: {}]  }
   0x1   :  { %3555 = sst [smem:[#allocation3_spill]] %s3535_s0  ;;  %v24_v0 = vstv %s3553_s18 }
   0x2   :  { %3556 = sst [smem:[#allocation4_spill]] %s3536_s1  ;;  %25 = vst [vmem:[#allocation2] sm:$0x1] %v24_v0 }
   0x3   :  { %3557 = sst [smem:[#allocation5_spill]] %s3537_s2 }
   0x4   :  { %3558 = sst [smem:[#allocation6_spill]] %s3538_s3 }
   0x5 LB: > { %s2439_s21 = sadd.s32 4294967295, %s2909_s20   ;;  %p2443_p0 = scmp.ge.s32.totalorder %s2909_s20, 1  ;;  %s2909_s20 = sphi %s3023_s20, %s31_s20  }
   0x6   : > { %p549_p1 = scmp.lt.s32.totalorder %s2909_s20, 3 }
   0x8   : > { %p550_p2 = pnand %p2443_p0, %p549_p1 }
   0x9   : > { %s3559_s2 = sld [smem:[#allocation5_spill]] (!%p550_p2)  ;;  %vm672_vm0 = vcmask (!%p550_p2), 1042432   ;;  %p610_p3 = scmp.lt.s32.totalorder (!%p550_p2), %s2439_s21, 1  ;;  %v806_v2 = vld [vmem:[%s3539_s4] sm:$0xff] (!%p550_p2)  ;;  %v807_v4 = vld [vmem:[%s3539_s4 + $0x8] sm:$0xff] (!%p550_p2)  ;;  %vm659_vm1 = vcmask (!%p550_p2), 48128  }
   0xa   : > { %553 = sbr.rel (%p550_p2) target bundleno = 3161 (0xc59), region = 96  ;;  %v810_v5 = vpack.c.bf16 (!%p550_p2), %v807_v4, %v806_v2  ;;  %s3560_s28 = sld [smem:[#allocation3_spill]] (!%p550_p2)  ;;  %v808_v19 = vld [vmem:[%s3539_s4 + $0x10] sm:$0xff] (!%p550_p2)  ;;  %v809_v20 = vld [vmem:[%s3539_s4 + $0x18] sm:$0xff] (!%p550_p2)  ;;  %vm819_vm2 = vcmask (!%p550_p2), 261120   ;;  %v2911_v48 = vmov (!%p550_p2), 0.0  }
   0xb   : > { %v811_v21 = vpack.c.bf16 (!%p550_p2), %v809_v20, %v808_v19  ;;  %s3561_s18 = sld [smem:[#allocation6_spill]] (!%p550_p2)  ;;  %s3562_s25 = sld [smem:[#allocation4_spill]] (!%p550_p2)  ;;  %2605 = vmatprep.subr.bf16.mxu1 (!%p550_p2), %v2911_v48  ;;  %v2456_v50 = vld [vmem:[%s3540_s5] ss:$0 sm:$0xff] (!%p550_p2)  ;;  %vm2913_vm3 = vmmov (!%p550_p2), 0   ;;  %vm757_vm4 = vcmask (!%p550_p2), 523264  }
   0xc   : > { %2613 = vmatprep.mubr.msk.bf16.mxu1 (!%p550_p2), %vm2913_vm3, %v2911_v48  ;;  %s2914_s0 = smov (!%p550_p2), 96   ;;  %s2915_s30 = smov (!%p550_p2), 80   ;;  %vm1303_vm5 = vcmask (!%p550_p2), 130048   ;;  %vm2363_vm6 = vcmask (!%p550_p2), 7168  }
   0xf   : > { %v650_v1 = vld [vmem:[%s3559_s2] sm:$0x3f] (!%p550_p2) }
  0x10   : > { %v651_v3 = vpack.c.bf16 (!%p550_p2), %v650_v1, %v650_v1 }
  0x11   : > { %s3564_s21 = smov (!%p610_p3, %s2439_s21), 1  ;;  %v2450_v23 = vld [vmem:[%s3561_s18] ss:$0 sm:$0xff] }
  0x12   : > { %2785 = vmatprep.subr.msk.bf16.mxu0 %vm672_vm0, %v651_v3  ;;  %v674_v6 = vsel %vm672_vm0, %v651_v3, 0  ;;  %s3040_s3 = sshll.u32 %s3564_s21, 6 }
  0x13   : > { %2596 = vmatpush3.bf16.msra.mxu0 %v674_v6  ;;  %s614_s29 = scalar_lea.vmem %s3560_s28, %s3040_s3  ;;  %s619_s26 = scalar_lea.vmem %s3562_s25, %s3040_s3 }
  0x14   : > { %2617 = vmatprep.subr.bf16.mxu0 %v810_v5  ;;  %v626_v7 = vld [vmem:[%s614_s29] sm:$0xff]  ;;  %v627_v8 = vld [vmem:[%s614_s29 + $0x8] sm:$0xff]  ;;  %v628_v9 = vld [vmem:[%s614_s29 + $0x10] sm:$0xff]  ;;  %s624_s18 = scalar_lea.vmem %s3554_s19, %s3040_s3 }
  0x15   : > { %v634_v10 = vpack.c.bf16 %v627_v8, %v626_v7  ;;  %v629_v11 = vld [vmem:[%s614_s29 + $0x18] sm:$0xff]  ;;  %v630_v12 = vld [vmem:[%s614_s29 + $0x20] sm:$0xff]  ;;  %v631_v13 = vld [vmem:[%s614_s29 + $0x28] sm:$0xff] }
  0x16   : > { %v635_v14 = vpack.c.bf16 %v629_v11, %v628_v9  ;;  %v636_v15 = vpack.c.bf16 %v631_v13, %v630_v12  ;;  %v632_v16 = vld [vmem:[%s614_s29 + $0x30] sm:$0xff]  ;;  %v633_v17 = vld [vmem:[%s614_s29 + $0x38] sm:$0xff]  ;;  %v3087_v43 = vld [vmem:[%s619_s26] sm:$0xff]  ;;  %s2912_s29 = smov 64  }
  0x17   : > { %2597 = vmatprep.mubr.msk.bf16.mxu0 %vm659_vm1, %v634_v10  ;;  %v637_v18 = vpack.c.bf16 %v633_v17, %v632_v16  ;;  %v3089_v44 = vld [vmem:[%s619_s26 + $0x8] sm:$0xff]  ;;  %v3095_v46 = vld [vmem:[%s619_s26 + $0x10] sm:$0xff]  ;;  %v3097_v47 = vld [vmem:[%s619_s26 + $0x18] sm:$0xff] }
  0x18   : > { %2598 = vmatmul.mubr.msk.bf16.vlgmr.msra.gmra.mrb[0].mxu0 %vm659_vm1, %v635_v14  ;;  %v3093_v45 = vpack.c.bf16 %v3089_v44, %v3087_v43  ;;  %v3108_v52 = vpack.c.bf16 %v3097_v47, %v3095_v46  ;;  %v3110_v54 = vld [vmem:[%s619_s26 + $0x20] sm:$0xff]  ;;  %v3112_v55 = vld [vmem:[%s619_s26 + $0x28] sm:$0xff]  ;;  %v3124_v0 = vld [vmem:[%s619_s26 + $0x30] sm:$0xff] }
  0x19   : > { %2601 = vmatprep.mubr.msk.bf16.mxu0 %vm659_vm1, %v636_v15  ;;  %2618 = vmatpush3.bf16.msra.mxu0 %v810_v5  ;;  %v3120_v62 = vpack.c.bf16 %v3112_v55, %v3110_v54  ;;  %v3126_v1 = vld [vmem:[%s619_s26 + $0x38] sm:$0xff]  ;;  %s2918_s26 = smov 48  }
  0x1a   : > { %2619 = vmatprep.subr.bf16.mxu0 %v811_v21  ;;  %2606 = vmatpush3.bf16.msra.mxu1 %v3093_v45  ;;  %v3133_v5 = vpack.c.bf16 %v3126_v1, %v3124_v0 }
  0x1b   : > { %2607 = vmatprep.subr.bf16.mxu1 %v2911_v48 }
  0x1d   : > { %2620 = vmatpush3.bf16.msra.mxu0 %v811_v21 }
  0x1e   : > { %2641 = vmatprep.subr.bf16.mxu0 %v2911_v48  ;;  %2608 = vmatpush3.bf16.msra.mxu1 %v3108_v52 }
  0x1f   : > { %2609 = vmatprep.subr.bf16.mxu1 %v2911_v48 }
  0x20   : > { %2602 = vmatmul.mubr.msk.bf16.gmra.mrb[4].mxu0 %vm659_vm1, %v637_v18 }
  0x22   : > { %2610 = vmatpush3.bf16.msra.mxu1 %v3120_v62 }
  0x23   : > { %2611 = vmatprep.subr.bf16.mxu1 %v2911_v48 }
  0x26   : > { %2612 = vmatpush3.bf16.msra.mxu1 %v3133_v5 }
  0x27   : > { %2629 = vmatprep.subr.bf16.mxu1 %v2911_v48 }
  0xeb   : > { %v2599_v22 = vpop.f32.mrb[0].mxu0 }
  0xec   : > { %v710_v24 = vpop.f32.mrb[1].mxu0  ;;  %v3061_v30 = vadd.f32 %v2599_v22, %v2450_v23  ;;  %v902_v22 = vld [vmem:[%s3542_s7] sm:$0xff] }
  0xed   : > { %v2600_v25 = vpop.f32.mrb[2].mxu0  ;;  %v3057_v28 = vadd.f32 %v2450_v23, %v710_v24 }
  0xee   : > { %v3055_v26 = vadd.f32 %v2600_v25, %v2450_v23  ;;  %v713_v27 = vpop.f32.mrb[3].mxu0 }
  0xef   : > { %v3059_v29 = vadd.f32 %v2450_v23, %v713_v27  ;;  %v904_v27 = vld [vmem:[%s3542_s7 + $0x10] sm:$0xff] }
  0xf0   : > { %v803_v32 = vpack.c.bf16 %v3055_v26, %v3061_v30 }
  0xf1   : > { %v802_v31 = vpack.c.bf16 %v3059_v29, %v3057_v28 }
  0xf3   : > { %v2603_v33 = vpop.f32.mrb[4].mxu0  ;;  %2621 = vmatprep.mubr.msk.bf16.mxu0 %vm819_vm2, %v802_v31  ;;  %v905_v31 = vld [vmem:[%s3542_s7 + $0x18] sm:$0xff] }
  0xf4   : > { %v3068_v34 = vadd.f32 %v2603_v33, %v2450_v23  ;;  %v726_v35 = vpop.f32.mrb[5].mxu0  ;;  %2622 = vmatmul.mubr.msk.bf16.vlgmr.msra.gmra.mrb[8].mxu0 %vm819_vm2, %v803_v32  ;;  %v3201_v32 = vpack.c.bf16 %v905_v31, %v904_v27  ;;  %v2916_v33 = vmov 0  }
  0xf5   : > { %v3071_v36 = vadd.f32 %v2450_v23, %v726_v35  ;;  %v2604_v37 = vpop.f32.mrb[6].mxu0 }
  0xf6   : > { %v3073_v38 = vadd.f32 %v2604_v37, %v2450_v23  ;;  %v729_v39 = vpop.f32.mrb[7].mxu0 }
  0xf7   : > { %v3075_v40 = vadd.f32 %v2450_v23, %v729_v39  ;;  %v903_v23 = vld [vmem:[%s3542_s7 + $0x8] sm:$0xff] }
  0xf8   : > { %v805_v41 = vpack.c.bf16 %v3073_v38, %v3068_v34  ;;  %v906_v24 = vpack.c.bf16 %v903_v23, %v902_v22 }
  0xf9   : > { %v804_v42 = vpack.c.bf16 %v3075_v40, %v3071_v36 }
  0xfa   : > { %2642 = vmatpush3.bf16.msra.mxu0 %v906_v24 }
  0xfb   : > { %2625 = vmatprep.mubr.msk.bf16.mxu0 %vm819_vm2, %v804_v42  ;;  %2643 = vmatprep.subr.bf16.mxu0 %v2911_v48 }
  0xfc   : > { %2626 = vmatmul.mubr.msk.bf16.gmra.mrb[12].mxu0 %vm819_vm2, %v805_v41 }
  0xfd   : > { %2645 = vmatprep.mubr.msk.bf16.mxu0 %vm2913_vm3, %v2911_v48 }
  0xfe   : > { %2644 = vmatpush3.bf16.msra.mxu0 %v3201_v32 }
  0xff   : > { %2661 = vmatprep.subr.bf16.mxu0 %v2911_v48 }
 0x1c7   : > { %v2623_v49 = vpop.f32.mrb[8].mxu0 }
 0x1c8   : > { %v866_v51 = vpop.f32.mrb[9].mxu0  ;;  %v875_v56 = vadd.f32 %v2623_v49, %v2456_v50 }
 0x1c9   : > { %v2624_v53 = vpop.f32.mrb[10].mxu0  ;;  %v867_v59 = vadd.f32 %v2456_v50, %v866_v51 }
 0x1ca   : > { %v878_v57 = vadd.f32 %v2624_v53, %v2456_v50  ;;  %v869_v58 = vpop.f32.mrb[11].mxu0 }
 0x1cb   : > { %v870_v60 = vadd.f32 %v2456_v50, %v869_v58 }
 0x1cc   : > { %v3116_v61 = vpack.c.bf16 %v878_v57, %v875_v56 }
 0x1cd   : > { %v3122_v63 = vpack.c.bf16 %v870_v60, %v867_v59 }
 0x1ce   : > { %918 = vrot.lane.b32.xlu0 %v3116_v61, %s2912_s29 }
 0x1cf   : > { %v2627_v2 = vpop.f32.mrb[12].mxu0 }
 0x1d0   : > { %v891_v3 = vadd.f32 %v2627_v2, %v2456_v50  ;;  %v882_v4 = vpop.f32.mrb[13].mxu0 }
 0x1d1   : > { %v883_v6 = vadd.f32 %v2456_v50, %v882_v4  ;;  %v2628_v7 = vpop.f32.mrb[14].mxu0  ;;  %v2917_v4 = vmov 1  }
 0x1d2   : > { %v894_v8 = vadd.f32 %v2628_v7, %v2456_v50  ;;  %v885_v9 = vpop.f32.mrb[15].mxu0  ;;  %916 = vrot.lane.b32.xlu0 %v3122_v63, %s2912_s29 }
 0x1d3   : > { %v886_v10 = vadd.f32 %v2456_v50, %v885_v9 }
 0x1d4   : > { %v3138_v11 = vpack.c.bf16 %v894_v8, %v891_v3 }
 0x1d5   : > { %v3140_v12 = vpack.c.bf16 %v886_v10, %v883_v6 }
 0x1d7   : > { %920 = vrot.lane.b32.xlu1 %v3140_v12, %s2912_s29 }
 0x1db   : > { %922 = vrot.lane.b32.xlu1 %v3138_v11, %s2912_s29  ;;  %s2919_s29 = smov 112  }
 0x1df   : > { %1153 = vrot.lane.b32.xlu1 %v3122_v63, %s2914_s0 }
 0x1e3   : > { %1155 = vrot.lane.b32.xlu1 %v3116_v61, %s2914_s0 }
 0x1e7   : > { %1157 = vrot.lane.b32.xlu1 %v3140_v12, %s2914_s0 }
 0x1eb   : > { %1159 = vrot.lane.b32.xlu1 %v3138_v11, %s2914_s0 }
 0x1f0   : > { %741 = vxpose.xlu0.c.b16.start [1/4] (short) (narrow) %v3093_v45, 16 }
 0x1f4   : > { %742 = vxpose.xlu0.c.b16.cont [2/4] (short) (narrow) %v3108_v52, 16 }
 0x1f8   : > { %743 = vxpose.xlu0.c.b16.cont [3/4] (short) (narrow) %v3120_v62, 16 }
 0x1fc   : > { %744 = vxpose.xlu0.c.b16.end [4/4] (short) (narrow) %v3133_v5, 16 }
 0x205   : > { %1436 = vrot.lane.b32.xlu0 %v3122_v63, %s2915_s30 }
 0x206   : > { %2803 = vset.pattern.permute.xlu0 %v2916_v33 }
 0x209   : > { %1438 = vrot.lane.b32.xlu0 %v3116_v61, %s2915_s30 }
 0x20d   : > { %1440 = vrot.lane.b32.xlu0 %v3140_v12, %s2915_s30 }
 0x211   : > { %1442 = vrot.lane.b32.xlu0 %v3138_v11, %s2915_s30 }
 0x240   : > { %v3162_v14 = vpop.permute.xlu0 %918 }
 0x244   : > { %v917_v17 = vpop.permute.xlu0 %916 }
 0x249   : > { %v3160_v13 = vpop.permute.xlu1 %920 }
 0x24d   : > { %v3164_v15 = vpop.permute.xlu1 %922 }
 0x251   : > { %v1154_v16 = vpop.permute.xlu1 %1153 }
 0x252   : > { %1165 = vxpose.xlu1.c.b16.start [1/4] (short) (narrow) %v1154_v16, 16 }
 0x255   : > { %v1156_v18 = vpop.permute.xlu1 %1155 }
 0x256   : > { %1166 = vxpose.xlu1.c.b16.cont [2/4] (short) (narrow) %v1156_v18, 16  ;;  %v749_v19 = vpop.trf.xlu0 }
 0x257   : > { %2614 = vmatmul.mubr.msk.bf16.vlgmr.msra.gmra.mrb[0].mxu1 %vm757_vm4, %v749_v19 }
 0x258   : > { %2630 = vmatpush3.bf16.msra.mxu1 %v917_v17  ;;  %2637 = vmatprep.mubr.msk.bf16.mxu1 %vm2913_vm3, %v2911_v48 }
 0x259   : > { %v1158_v20 = vpop.permute.xlu1 %1157  ;;  %2631 = vmatprep.subr.bf16.mxu1 %v2911_v48 }
 0x25a   : > { %1167 = vxpose.xlu1.c.b16.cont [3/4] (short) (narrow) %v1158_v20, 16 }
 0x25c   : > { %2632 = vmatpush3.bf16.msra.mxu1 %v3162_v14 }
 0x25d   : > { %v1160_v21 = vpop.permute.xlu1 %1159  ;;  %2633 = vmatprep.subr.bf16.mxu1 %v2911_v48 }
 0x25e   : > { %1168 = vxpose.xlu1.c.b16.end [4/4] (short) (narrow) %v1160_v21, 16 }
 0x260   : > { %2634 = vmatpush3.bf16.msra.mxu1 %v3160_v13 }
 0x261   : > { %2635 = vmatprep.subr.bf16.mxu1 %v2911_v48 }
 0x262   : > { %2804 = vset.pattern.permute.xlu1 %v2916_v33 }
 0x264   : > { %2636 = vmatpush3.bf16.msra.mxu1 %v3164_v15 }
 0x265   : > { %2649 = vmatprep.subr.bf16.mxu1 %v2911_v48 }
 0x267   : > { %2638 = vmatmul.mubr.msk.bf16.vlgmr.msra.gmra.mrb[4].mxu1 %vm757_vm4, %v749_v19 }
 0x268   : > { %2650 = vmatpush3.bf16.msra.mxu1 %v3093_v45  ;;  %2657 = vmatprep.mubr.msk.bf16.mxu1 %vm2913_vm3, %v2911_v48 }
 0x269   : > { %2651 = vmatprep.subr.bf16.mxu1 %v2911_v48 }
 0x26c   : > { %2652 = vmatpush3.bf16.msra.mxu1 %v3108_v52 }
 0x26d   : > { %2653 = vmatprep.subr.bf16.mxu1 %v2911_v48 }
 0x270   : > { %2654 = vmatpush3.bf16.msra.mxu1 %v3120_v62 }
 0x271   : > { %2655 = vmatprep.subr.bf16.mxu1 %v2911_v48 }
 0x274   : > { %2656 = vmatpush3.bf16.msra.mxu1 %v3133_v5 }
 0x275   : > { %2673 = vmatprep.subr.bf16.mxu1 %v2911_v48 }
 0x277   : > { %v1437_v6 = vpop.permute.xlu0 %1436 }
 0x27b   : > { %v1439_v7 = vpop.permute.xlu0 %1438 }
 0x27f   : > { %v1441_v8 = vpop.permute.xlu0 %1440 }
 0x283   : > { %v1443_v9 = vpop.permute.xlu0 %1442 }
 0x2b8   : > { %v1173_v25 = vpop.trf.xlu1 }
 0x2b9   : > { %2658 = vmatmul.mubr.msk.bf16.vlgmr.msra.gmra.mrb[8].mxu1 %vm757_vm4, %v1173_v25 }
 0x2ba   : > { %2674 = vmatpush3.bf16.msra.mxu1 %v906_v24  ;;  %2675 = vmatprep.mubr.msk.bf16.mxu1 %vm2913_vm3, %v2911_v48 }
 0x2bb   : > { %2689 = vmatprep.subr.bf16.mxu1 %v2911_v48 }
 0x32a   : > { %v3210_v35 = vpop.f32.mrb[0].mxu1 }
 0x32b   : > { %v2615_v37 = vpop.f32.mrb[1].mxu1 }
 0x32c   : > { %v798_v39 = vpop.f32.mrb[2].mxu1 }
 0x32d   : > { %v2616_v41 = vpop.f32.mrb[3].mxu1 }
 0x33a   : > { %v962_v42 = vpop.f32.mrb[4].mxu1 }
 0x33b   : > { %v968_v49 = vmul.f32 0.015625, %v962_v42  ;;  %v2639_v50 = vpop.f32.mrb[5].mxu1 }
 0x33c   : > { %v965_v51 = vpop.f32.mrb[6].mxu1 }
 0x33d   : > { %v989_v53 = vpack.c.bf16 %v968_v49, %v968_v49  ;;  %v2640_v56 = vpop.f32.mrb[7].mxu1 }
 0x33f   : > { %2646 = vmatmul.mubr.msk.bf16.vlgmr.msra.gmra.mrb[16].mxu0 %vm819_vm2, %v989_v53 }
 0x340   : > { %2662 = vmatpush3.bf16.msra.mxu0 %v917_v17  ;;  %2669 = vmatprep.mubr.msk.bf16.mxu0 %vm2913_vm3, %v2911_v48 }
 0x341   : > { %2663 = vmatprep.subr.bf16.mxu0 %v2911_v48 }
 0x344   : > { %2664 = vmatpush3.bf16.msra.mxu0 %v3162_v14 }
 0x345   : > { %2665 = vmatprep.subr.bf16.mxu0 %v2911_v48 }
 0x348   : > { %2666 = vmatpush3.bf16.msra.mxu0 %v3160_v13 }
 0x349   : > { %2667 = vmatprep.subr.bf16.mxu0 %v2911_v48 }
 0x34c   : > { %2668 = vmatpush3.bf16.msra.mxu0 %v3164_v15 }
 0x34f   : > { %2670 = vmatmul.mubr.msk.bf16.vlgmr.msra.gmra.mrb[20].mxu0 %vm757_vm4, %v1173_v25 }
 0x350   : > { %2681 = vmatprep.mubr.msk.bf16.mxu0 %vm1303_vm5, %v3122_v63 }
 0x38c   : > { %v1218_v57 = vpop.f32.mrb[8].mxu1 }
 0x38d   : > { %v1225_v58 = vmul.f32 0.015625, %v1218_v57  ;;  %v2659_v59 = vpop.f32.mrb[9].mxu1 }
 0x38e   : > { %v1221_v60 = vpop.f32.mrb[10].mxu1 }
 0x38f   : > { %v1226_v2 = vmul.f32 0.015625, %v1221_v60  ;;  %1272 = vperm.xlu0 %2803, %v1225_v58   ;;  %v2660_v3 = vpop.f32.mrb[11].mxu1 }
 0x391   : > { %1277 = vperm.xlu1 %2804, %v1226_v2  }
 0x393   : > { %2806 = vset.pattern.permute.xlu0 %v2917_v4 }
 0x394   : > { %1291 = vperm.xlu0 %2806, %v1226_v2  }
 0x395   : > { %2805 = vset.pattern.permute.xlu1 %v2917_v4 }
 0x396   : > { %1287 = vperm.xlu1 %2805, %v1225_v58  }
 0x398   : > { %1514 = vrot.lane.b32.xlu0 %v3140_v12, %s2918_s26 }
 0x39a   : > { %1510 = vrot.lane.b32.xlu1 %v3122_v63, %s2918_s26 }
 0x39b   : > { %2807 = vset.pattern.permute.xlu1 %v2916_v33 }
 0x39e   : > { %1512 = vrot.lane.b32.xlu1 %v3116_v61, %s2918_s26 }
 0x3a2   : > { %1516 = vrot.lane.b32.xlu1 %v3138_v11, %s2918_s26 }
 0x3b6   : > { %1448 = vxpose.xlu0.c.b16.start [1/4] (short) (narrow) %v1437_v6, 16 }
 0x3ba   : > { %1449 = vxpose.xlu0.c.b16.cont [2/4] (short) (narrow) %v1439_v7, 16 }
 0x3be   : > { %1450 = vxpose.xlu0.c.b16.cont [3/4] (short) (narrow) %v1441_v8, 16 }
 0x3c2   : > { %1451 = vxpose.xlu0.c.b16.end [4/4] (short) (narrow) %v1443_v9, 16 }
 0x3cb   : > { %1095 = vperm.xlu0 %2806, %v3095_v46  }
 0x3cf   : > { %2816 = vset.pattern.permute.xlu0 %v2916_v33 }
 0x3d0   : > { %1041 = vperm.xlu0 %2816, %v3089_v44  }
 0x3d4   : > { %1046 = vperm.xlu0 %2816, %v3095_v46  }
 0x3d8   : > { %1061 = vperm.xlu0 %2816, %v3112_v55  }
 0x3dc   : > { %1066 = vperm.xlu0 %2816, %v3124_v0  }
 0x3e0   : > { %2821 = vset.pattern.permute.xlu0 %v2917_v4 }
 0x3e1   : > { %1111 = vperm.xlu0 %2821, %v3124_v0  }
 0x40e   : > { %v1273_v46 = vpop.permute.xlu0 %1272 }
 0x410   : > { %v1278_v27 = vpop.permute.xlu1 %1277 }
 0x412   : > { %v3239_v10 = vpop.f32.mrb[16].mxu0 }
 0x413   : > { %v2647_v13 = vpop.f32.mrb[17].mxu0  ;;  %v1292_v0 = vpop.permute.xlu0 %1291 }
 0x414   : > { %v1030_v14 = vpop.f32.mrb[18].mxu0 }
 0x415   : > { %v2648_v15 = vpop.f32.mrb[19].mxu0  ;;  %v1288_v37 = vpop.permute.xlu1 %1287 }
 0x417   : > { %v1515_v23 = vpop.permute.xlu0 %1514 }
 0x419   : > { %v1511_v3 = vpop.permute.xlu1 %1510 }
 0x41c   : > { %v1456_v24 = vpop.trf.xlu0 }
 0x41d   : > { %v1513_v6 = vpop.permute.xlu1 %1512 }
 0x421   : > { %v1517_v15 = vpop.permute.xlu1 %1516 }
 0x422   : > { %v1261_v16 = vpop.f32.mrb[20].mxu0 }
 0x423   : > { %v2671_v17 = vpop.f32.mrb[21].mxu0  ;;  %v1268_v19 = vmul.f32 0.015625, %v1261_v16 }
 0x424   : > { %v1264_v18 = vpop.f32.mrb[22].mxu0 }
 0x425   : > { %v1269_v20 = vmul.f32 0.015625, %v1264_v18  ;;  %v2672_v21 = vpop.f32.mrb[23].mxu0 }
 0x427   : > { %v1302_v22 = vpack.c.bf16 %v1269_v20, %v1268_v19 }
 0x429   : > { %2676 = vmatmul.mubr.msk.bf16.vlgmr.msra.gmra.mrb[12].mxu1 %vm1303_vm5, %v1302_v22 }
 0x42a   : > { %2690 = vmatpush3.bf16.msra.mxu1 %v3093_v45  ;;  %2697 = vmatprep.mubr.msk.bf16.mxu1 %vm2913_vm3, %v2911_v48  ;;  %v974_v45 = vlaneseq }
 0x42b   : > { %2691 = vmatprep.subr.bf16.mxu1 %v2911_v48 }
 0x42e   : > { %2692 = vmatpush3.bf16.msra.mxu1 %v3108_v52  ;;  %v3256_v52 = vshrl.u32 %v974_v45, 7 }
 0x42f   : > { %2693 = vmatprep.subr.bf16.mxu1 %v2911_v48 }
 0x430   : > { %v3259_v25 = vsub.s32 0, %v3256_v52 }
 0x432   : > { %2694 = vmatpush3.bf16.msra.mxu1 %v3120_v62  ;;  %v3262_v62 = vsub.s32 1, %v3256_v52 }
 0x433   : > { %2695 = vmatprep.subr.bf16.mxu1 %v2911_v48 }
 0x436   : > { %2696 = vmatpush3.bf16.msra.mxu1 %v3133_v5  ;;  %v3267_v5 = vld [vmem:[%s3541_s6] sm:$0xf] }
 0x437   : > { %2713 = vmatprep.subr.bf16.mxu1 %v2911_v48  ;;  %v1283_v31 = vrot.slane %v3267_v5, %v3259_v25 }
 0x439   : > { %2698 = vmatmul.mubr.msk.bf16.vlgmr.msra.gmra.mrb[16].mxu1 %vm757_vm4, %v1456_v24  ;;  %v1284_v39 = vmul.f32 %v1283_v31, %v1273_v46  ;;  %v1285_v42 = vmul.f32 %v1283_v31, %v1278_v27 }
 0x43a   : > { %2714 = vmatpush3.bf16.msra.mxu1 %v3201_v32  ;;  %2715 = vmatprep.mubr.msk.bf16.mxu1 %vm2913_vm3, %v2911_v48  ;;  %v1297_v32 = vrot.slane %v3267_v5, %v3262_v62 }
 0x43c   : > { %v1298_v41 = vmul.f32 %v1297_v32, %v1288_v37  ;;  %v1299_v49 = vmul.f32 %v1297_v32, %v1292_v0 }
 0x43e   : > { %v1300_v50 = vadd.f32 %v1298_v41, %v1284_v39  ;;  %v1301_v57 = vadd.f32 %v1299_v49, %v1285_v42 }
 0x4fc   : > { %v1341_v51 = vpop.f32.mrb[12].mxu1 }
 0x4fd   : > { %v1348_v53 = vadd.f32 %v1341_v51, %v1300_v50  ;;  %v2677_v56 = vpop.f32.mrb[13].mxu1 }
 0x4fe   : > { %v1344_v58 = vpop.f32.mrb[14].mxu1 }
 0x4ff   : > { %v1349_v59 = vadd.f32 %v1344_v58, %v1301_v57  ;;  %v2678_v60 = vpop.f32.mrb[15].mxu1  ;;  %v909_v58 = vrot.slane %v3267_v5, 2 }
 0x501   : > { %v1350_v2 = vpack.c.bf16 %v1349_v59, %v1348_v53  ;;  %v1096_v59 = vpop.permute.xlu0 %1095 }
 0x503   : > { %2679 = vmatprep.subr.bf16.mxu0 %v1350_v2 }
 0x504   : > { %2680 = vmatpush3.bf16.msra.mxu0 %v1350_v2  ;;  %v911_v2 = vadd.f32 %v909_v58, %v3267_v5 }
 0x505   : > { %2701 = vmatprep.subr.bf16.mxu0 %v2911_v48 }
 0x507   : > { %2682 = vmatmul.mubr.msk.bf16.vlgmr.msra.gmra.mrb[24].mxu0 %vm1303_vm5, %v3116_v61 }
 0x508   : > { %2685 = vmatprep.mubr.msk.bf16.mxu0 %vm1303_vm5, %v3140_v12  ;;  %2702 = vmatpush3.bf16.msra.mxu0 %v1511_v3  ;;  %v986_v3 = vrot.slane %v911_v2, %v3262_v62 }
 0x509   : > { %2703 = vmatprep.subr.bf16.mxu0 %v2911_v48 }
 0x50c   : > { %v1501_v7 = vpop.f32.mrb[16].mxu1  ;;  %2704 = vmatpush3.bf16.msra.mxu0 %v1513_v6  ;;  %v1042_v6 = vpop.permute.xlu0 %1041 }
 0x50d   : > { %v1508_v8 = vmul.f32 0.015625, %v1501_v7  ;;  %2705 = vmatprep.subr.bf16.mxu0 %v2911_v48  ;;  %v2699_v9 = vpop.f32.mrb[17].mxu1  ;;  %v977_v7 = vrot.slane %v911_v2, %v3259_v25 }
 0x50e   : > { %v1504_v13 = vpop.f32.mrb[18].mxu1 }
 0x50f   : > { %1567 = vperm.xlu1 %2807, %v1508_v8   ;;  %2686 = vmatmul.mubr.msk.bf16.gmra.mrb[28].mxu0 %vm1303_vm5, %v3138_v11  ;;  %v2700_v14 = vpop.f32.mrb[19].mxu1  ;;  %v1509_v16 = vmul.f32 0.015625, %v1504_v13 }
 0x510   : > { %2706 = vmatpush3.bf16.msra.mxu0 %v1515_v23  ;;  %2709 = vmatprep.mubr.msk.bf16.mxu0 %vm2913_vm3, %v2911_v48  ;;  %v1047_v14 = vpop.permute.xlu0 %1046 }
 0x511   : > { %2707 = vmatprep.subr.bf16.mxu0 %v2911_v48  ;;  %v801_v48 = vmul.f32 0.015625, %v3210_v35 }
 0x513   : > { %2808 = vset.pattern.permute.xlu1 %v2917_v4 }
 0x514   : > { %1582 = vperm.xlu1 %2808, %v1508_v8   ;;  %2708 = vmatpush3.bf16.msra.mxu0 %v1517_v15 }
 0x517   : > { %2710 = vmatmul.mubr.msk.bf16.vlgmr.msra.gmra.mrb[32].mxu0 %vm757_vm4, %v1456_v24 }
 0x518   : > { %2809 = vset.pattern.permute.xlu1 %v2916_v33 }
 0x519   : > { %1572 = vperm.xlu1 %2809, %v1509_v16  }
 0x51d   : > { %2810 = vset.pattern.permute.xlu1 %v2917_v4 }
 0x51e   : > { %1586 = vperm.xlu1 %2810, %v1509_v16  }
 0x522   : > { %1645 = vrot.lane.b32.xlu1 %v3122_v63, %s2919_s29 }
 0x523   : > { %2811 = vset.pattern.permute.xlu1 %v2916_v33 }
 0x526   : > { %1647 = vrot.lane.b32.xlu1 %v3116_v61, %s2919_s29 }
 0x52a   : > { %1649 = vrot.lane.b32.xlu1 %v3140_v12, %s2919_s29 }
 0x52e   : > { %1651 = vrot.lane.b32.xlu1 %v3138_v11, %s2919_s29 }
 0x532   : > { %971 = vperm.xlu1 %2811, %v801_v48  }
 0x536   : > { %2812 = vset.pattern.permute.xlu1 %v2917_v4 }
 0x537   : > { %980 = vperm.xlu1 %2812, %v801_v48  }
 0x53b   : > { %2813 = vset.pattern.permute.xlu1 %v2916_v33 }
 0x53c   : > { %1036 = vperm.xlu1 %2813, %v3087_v43  }
 0x540   : > { %2814 = vset.pattern.permute.xlu1 %v2917_v4 }
 0x541   : > { %1087 = vperm.xlu1 %2814, %v3087_v43   ;;  %v1577_v43 = vsub.s32 2, %v3256_v52 }
 0x545   : > { %1091 = vperm.xlu1 %2814, %v3089_v44   ;;  %v1591_v44 = vsub.s32 3, %v3256_v52 }
 0x547   : > { %v1592_v63 = vrot.slane %v3267_v5, %v1591_v44 }
 0x549   : > { %2815 = vset.pattern.permute.xlu1 %v2916_v33 }
 0x54a   : > { %1051 = vperm.xlu1 %2815, %v3097_v47  }
 0x54e   : > { %2817 = vset.pattern.permute.xlu1 %v2917_v4 }
 0x54f   : > { %1099 = vperm.xlu1 %2817, %v3097_v47   ;;  %v1578_v47 = vrot.slane %v3267_v5, %v1577_v43  ;;  %v1062_v43 = vpop.permute.xlu0 %1061 }
 0x553   : > { %2818 = vset.pattern.permute.xlu1 %v2916_v33  ;;  %v1067_v5 = vpop.permute.xlu0 %1066 }
 0x554   : > { %1056 = vperm.xlu1 %2818, %v3110_v54  }
 0x558   : > { %2819 = vset.pattern.permute.xlu1 %v2917_v4 }
 0x559   : > { %1103 = vperm.xlu1 %2819, %v3110_v54  }
 0x55d   : > { %1107 = vperm.xlu1 %2819, %v3112_v55  }
 0x561   : > { %2820 = vset.pattern.permute.xlu1 %v2916_v33 }
 0x562   : > { %1071 = vperm.xlu1 %2820, %v3126_v1  }
 0x566   : > { %2822 = vset.pattern.permute.xlu1 %v2917_v4 }
 0x567   : > { %1115 = vperm.xlu1 %2822, %v3126_v1  }
 0x58e   : > { %v1568_v61 = vpop.permute.xlu1 %1567 }
 0x58f   : > { %v1579_v54 = vmul.f32 %v1578_v47, %v1568_v61 }
 0x593   : > { %v1583_v11 = vpop.permute.xlu1 %1582 }
 0x594   : > { %v1593_v55 = vmul.f32 %v1592_v63, %v1583_v11 }
 0x596   : > { %v1595_v12 = vadd.f32 %v1593_v55, %v1579_v54 }
 0x598   : > { %v1573_v33 = vpop.permute.xlu1 %1572 }
 0x599   : > { %v1580_v19 = vmul.f32 %v1578_v47, %v1573_v33 }
 0x59d   : > { %v1587_v35 = vpop.permute.xlu1 %1586 }
 0x59e   : > { %v1594_v20 = vmul.f32 %v1592_v63, %v1587_v35 }
 0x5a0   : > { %v1596_v23 = vadd.f32 %v1594_v20, %v1580_v19 }
 0x5a1   : > { %v1646_v17 = vpop.permute.xlu1 %1645 }
 0x5a2   : > { %2721 = vmatprep.mubr.msk.bf16.mxu0 %vm1303_vm5, %v1646_v17 }
 0x5a5   : > { %v1648_v37 = vpop.permute.xlu1 %1647 }
 0x5a9   : > { %v1650_v41 = vpop.permute.xlu1 %1649 }
 0x5ad   : > { %v1652_v42 = vpop.permute.xlu1 %1651 }
 0x5b1   : > { %v972_v49 = vpop.permute.xlu1 %971 }
 0x5b2   : > { %v978_v13 = vmul.f32 %v977_v7, %v972_v49 }
 0x5b6   : > { %v981_v50 = vpop.permute.xlu1 %980 }
 0x5b7   : > { %v987_v9 = vmul.f32 %v986_v3, %v981_v50 }
 0x5b9   : > { %v988_v15 = vadd.f32 %v987_v9, %v978_v13 }
 0x5bb   : > { %v1037_v51 = vpop.permute.xlu1 %1036  ;;  %v1033_v48 = vadd.f32 %v3239_v10, %v988_v15  ;;  %v2463_v10 = vld [vmem:[%s3543_s8] ss:$0 sm:$0xff] }
 0x5bd   : > { %v1077_v47 = vrot.slane %v1033_v48, %v3259_v25  ;;  %v1121_v61 = vrot.slane %v1033_v48, %v3262_v62 }
 0x5bf   : > { %v1080_v63 = vmul.f32 %v1077_v47, %v1047_v14  ;;  %v1124_v54 = vmul.f32 %v1121_v61, %v1096_v59  ;;  %v1078_v33 = vmul.f32 %v1077_v47, %v1037_v51  ;;  %v1079_v19 = vmul.f32 %v1077_v47, %v1042_v6 }
 0x5c0   : > { %v1088_v53 = vpop.permute.xlu1 %1087 }
 0x5c1   : > { %v1122_v11 = vmul.f32 %v1121_v61, %v1088_v53 }
 0x5c4   : > { %v1092_v56 = vpop.permute.xlu1 %1091 }
 0x5c5   : > { %v1123_v35 = vmul.f32 %v1121_v61, %v1092_v56 }
 0x5c9   : > { %v1052_v57 = vpop.permute.xlu1 %1051 }
 0x5ca   : > { %v1081_v17 = vmul.f32 %v1077_v47, %v1052_v57  ;;  %v1083_v57 = vmul.f32 %v1077_v47, %v1062_v43 }
 0x5ce   : > { %v1100_v60 = vpop.permute.xlu1 %1099 }
 0x5d3   : > { %v1057_v8 = vpop.permute.xlu1 %1056 }
 0x5d8   : > { %v1104_v16 = vpop.permute.xlu1 %1103 }
 0x5dc   : > { %v1108_v44 = vpop.permute.xlu1 %1107 }
 0x5e1   : > { %v1072_v55 = vpop.permute.xlu1 %1071 }
 0x5e2   : > { %v1085_v51 = vmul.f32 %v1077_v47, %v1072_v55 }
 0x5e6   : > { %v1116_v62 = vpop.permute.xlu1 %1115 }
 0x5ea   : > { %v1556_v4 = vpop.f32.mrb[32].mxu0 }
 0x5eb   : > { %v2711_v1 = vpop.f32.mrb[33].mxu0  ;;  %v1563_v21 = vmul.f32 0.015625, %v1556_v4  ;;  %v1132_v4 = vadd.f32 %v1124_v54, %v1080_v63 }
 0x5ec   : > { %v1559_v18 = vpop.f32.mrb[34].mxu0  ;;  %v1112_v1 = vpop.permute.xlu0 %1111 }
 0x5ed   : > { %v1564_v46 = vmul.f32 0.015625, %v1559_v18  ;;  %v2712_v22 = vpop.f32.mrb[35].mxu0  ;;  %v1130_v18 = vadd.f32 %v1122_v11, %v1078_v33 }
 0x5ee   : > { %v1128_v22 = vmul.f32 %v1121_v61, %v1112_v1 }
 0x5ef   : > { %v1597_v0 = vpack.c.bf16 %v1564_v46, %v1563_v21  ;;  %v1131_v21 = vadd.f32 %v1123_v35, %v1079_v19  ;;  %v1084_v46 = vmul.f32 %v1077_v47, %v1067_v5 }
 0x5f1   : > { %2716 = vmatmul.mubr.msk.bf16.vlgmr.msra.gmra.mrb[20].mxu1 %vm1303_vm5, %v1597_v0  ;;  %v1147_v0 = vadd.f32 %v2463_v10, %v1132_v4  ;;  %v1146_v49 = vadd.f32 %v2463_v10, %v1131_v21  ;;  %v1136_v50 = vadd.f32 %v1128_v22, %v1084_v46 }
 0x5f3   : > { %v1151_v9 = vadd.f32 %v2463_v10, %v1136_v50 }
 0x6c4   : > { %v1635_v24 = vpop.f32.mrb[20].mxu1 }
 0x6c5   : > { %v1642_v45 = vadd.f32 %v1635_v24, %v1595_v12  ;;  %v2717_v52 = vpop.f32.mrb[21].mxu1  ;;  %v1125_v12 = vmul.f32 %v1121_v61, %v1100_v60 }
 0x6c6   : > { %v1638_v27 = vpop.f32.mrb[22].mxu1  ;;  %v1129_v52 = vmul.f32 %v1121_v61, %v1116_v62 }
 0x6c7   : > { %v1643_v31 = vadd.f32 %v1638_v27, %v1596_v23  ;;  %v2718_v32 = vpop.f32.mrb[23].mxu1  ;;  %v1133_v20 = vadd.f32 %v1125_v12, %v1081_v17  ;;  %v1126_v23 = vmul.f32 %v1121_v61, %v1104_v16 }
 0x6c8   : > { %v1137_v2 = vadd.f32 %v1129_v52, %v1085_v51 }
 0x6c9   : > { %v1644_v39 = vpack.c.bf16 %v1643_v31, %v1642_v45  ;;  %v1145_v45 = vadd.f32 %v2463_v10, %v1130_v18  ;;  %v1148_v32 = vadd.f32 %v2463_v10, %v1133_v20 }
 0x6cb   : > { %2719 = vmatprep.subr.bf16.mxu0 %v1644_v39 }
 0x6cc   : > { %2720 = vmatpush3.bf16.msra.mxu0 %v1644_v39  ;;  %v1127_v39 = vmul.f32 %v1121_v61, %v1108_v44 }
 0x6ce   : > { %v1135_v3 = vadd.f32 %v1127_v39, %v1083_v57 }
 0x6cf   : > { %2722 = vmatmul.mubr.msk.bf16.vlgmr.msra.gmra.mrb[24].mxu0 %vm1303_vm5, %v1648_v37  ;;  %v1082_v37 = vmul.f32 %v1077_v47, %v1057_v8 }
 0x6d0   : > { %2725 = vmatprep.mubr.msk.bf16.mxu0 %vm1303_vm5, %v1650_v41  ;;  %v1150_v5 = vadd.f32 %v2463_v10, %v1135_v3 }
 0x6d1   : > { %v1134_v58 = vadd.f32 %v1126_v23, %v1082_v37 }
 0x6d3   : > { %v1149_v14 = vadd.f32 %v2463_v10, %v1134_v58 }
 0x6d7   : > { %2726 = vmatmul.mubr.msk.bf16.gmra.mrb[28].mxu0 %vm1303_vm5, %v1652_v42 }
 0x7a2   : > { %v2723_v24 = vpop.f32.mrb[24].mxu0 }
 0x7a3   : > { %v2769_v27 = vadd.f32 %v2723_v24, %v1147_v0  ;;  %v1699_v31 = vpop.f32.mrb[25].mxu0 }
 0x7a4   : > { %v2770_v41 = vadd.f32 %v1699_v31, %v1145_v45  ;;  %v2724_v42 = vpop.f32.mrb[26].mxu0 }
 0x7a5   : > { %v2771_v53 = vadd.f32 %v2724_v42, %v1148_v32  ;;  %v1702_v56 = vpop.f32.mrb[27].mxu0  ;;  %v1740_v16 = vadd.f32 %v2769_v27, %v3061_v30 }
 0x7a6   : > { %v2772_v59 = vadd.f32 %v1702_v56, %v1146_v49  ;;  %v1738_v60 = vadd.f32 %v2770_v41, %v3057_v28  ;;  %v1152_v28 = vadd.f32 %v2463_v10, %v1137_v2 }
 0x7a7   : > { %v1741_v8 = vadd.f32 %v2771_v53, %v3055_v26  ;;  %v1752_v54 = vsel %vm819_vm2, %v1740_v16, 0.0 }
 0x7a8   : > { %v1746_v6 = vsel %vm819_vm2, %v1738_v60, 0.0  ;;  %v1739_v7 = vadd.f32 %v2772_v59, %v3059_v29 }
 0x7a9   : > { %1747 = vadd.xlane.f32.xlu1 %v1746_v6  ;;  %v1755_v61 = vsel %vm819_vm2, %v1741_v8, 0.0 }
 0x7aa   : > { %v2727_v13 = vpop.f32.mrb[28].mxu0  ;;  %v1749_v15 = vsel %vm819_vm2, %v1739_v7, 0.0 }
 0x7ab   : > { %v2773_v48 = vadd.f32 %v2727_v13, %v1151_v9  ;;  %v1715_v43 = vpop.f32.mrb[29].mxu0  ;;  %1750 = vadd.xlane.f32.xlu0 %v1749_v15  ;;  %v1881_v13 = vld [vmem:[%s3546_s11] sm:$0xff] }
 0x7ac   : > { %v2774_v44 = vadd.f32 %v1715_v43, %v1149_v14  ;;  %v2728_v47 = vpop.f32.mrb[30].mxu0  ;;  %v1882_v14 = vld [vmem:[%s3546_s11 + $0x8] sm:$0xff] }
 0x7ad   : > { %v2775_v29 = vadd.f32 %v2728_v47, %v1152_v28  ;;  %1756 = vadd.xlane.f32.xlu1 %v1755_v61  ;;  %v1718_v26 = vpop.f32.mrb[31].mxu0  ;;  %v1744_v35 = vadd.f32 %v2773_v48, %v3068_v34  ;;  %v1889_v15 = vpack.c.bf16 %v1882_v14, %v1881_v13  ;;  %v1884_v48 = vld [vmem:[%s3546_s11 + $0x18] sm:$0xff] }
 0x7ae   : > { %v2776_v63 = vadd.f32 %v1718_v26, %v1150_v5  ;;  %v1742_v11 = vadd.f32 %v2774_v44, %v3071_v36 }
 0x7af   : > { %1753 = vadd.xlane.f32.xlu0 %v1752_v54  ;;  %v1745_v33 = vadd.f32 %v2775_v29, %v3073_v38  ;;  %v1764_v4 = vsel %vm819_vm2, %v1744_v35, 0.0  ;;  %2729 = vmatprep.subr.bf16.mxu1 %v1889_v15 }
 0x7b0   : > { %v1743_v30 = vadd.f32 %v2776_v63, %v3075_v40  ;;  %v1758_v55 = vsel %vm819_vm2, %v1742_v11, 0.0  ;;  %2730 = vmatpush3.bf16.msra.mxu1 %v1889_v15 }
 0x7b1   : > { %v1767_v17 = vsel %vm819_vm2, %v1745_v33, 0.0 }
 0x7b2   : > { %v1761_v12 = vsel %vm819_vm2, %v1743_v30, 0.0 }
 0x7b3   : > { %1759 = vadd.xlane.f32.xlu0 %v1758_v55  ;;  %1762 = vadd.xlane.f32.xlu1 %v1761_v12 }
 0x7b7   : > { %1768 = vadd.xlane.f32.xlu1 %v1767_v17  ;;  %1765 = vadd.xlane.f32.xlu0 %v1764_v4 }
 0x836   : > { %v1748_v36 = vpop.xlane.xlu1 %1747 }
 0x837   : > { %v1771_v1 = vmul.f32 0.03125, %v1748_v36 }
 0x838   : > { %v1751_v18 = vpop.xlane.xlu0 %1750 }
 0x839   : > { %v3349_v40 = vsub.f32 %v1738_v60, %v1771_v1  ;;  %v1772_v19 = vmul.f32 0.03125, %v1751_v18 }
 0x83a   : > { %v1757_v10 = vpop.xlane.xlu1 %1756 }
 0x83b   : > { %v3351_v20 = vsub.f32 %v1739_v7, %v1772_v19  ;;  %v1774_v38 = vmul.f32 0.03125, %v1757_v10  ;;  %v1787_v34 = vmul.f32 %v3349_v40, %v3349_v40  ;;  %v2478_v10 = vld [vmem:[%s3544_s9] ss:$0 sm:$0xff] }
 0x83c   : > { %v1754_v21 = vpop.xlane.xlu0 %1753 }
 0x83d   : > { %v3355_v62 = vsub.f32 %v1741_v8, %v1774_v38  ;;  %v1773_v46 = vmul.f32 0.03125, %v1754_v21  ;;  %v1795_v22 = vsel %vm819_vm2, %v1787_v34, 0.0  ;;  %v1788_v0 = vmul.f32 %v3351_v20, %v3351_v20 }
 0x83e   : > { %1796 = vadd.xlane.f32.xlu0 %v1795_v22 }
 0x83f   : > { %v3360_v23 = vsub.f32 %v1740_v16, %v1773_v46  ;;  %v1798_v24 = vsel %vm819_vm2, %v1788_v0, 0.0  ;;  %v1790_v45 = vmul.f32 %v3355_v62, %v3355_v62  ;;  %v1883_v16 = vld [vmem:[%s3546_s11 + $0x10] sm:$0xff] }
 0x840   : > { %v1763_v52 = vpop.xlane.xlu1 %1762  ;;  %1799 = vadd.xlane.f32.xlu1 %v1798_v24  ;;  %v1760_v27 = vpop.xlane.xlu0 %1759  ;;  %v1890_v43 = vpack.c.bf16 %v1884_v48, %v1883_v16 }
 0x841   : > { %v1776_v31 = vmul.f32 0.03125, %v1763_v52  ;;  %v1775_v32 = vmul.f32 0.03125, %v1760_v27  ;;  %v1789_v37 = vmul.f32 %v3360_v23, %v3360_v23  ;;  %v1804_v42 = vsel %vm819_vm2, %v1790_v45, 0.0  ;;  %v2479_v52 = vld [vmem:[%s3545_s10] ss:$0 sm:$0xff] }
 0x842   : > { %2731 = vmatprep.subr.bf16.mxu1 %v1890_v43 }
 0x843   : > { %v3367_v39 = vsub.f32 %v1743_v30, %v1776_v31  ;;  %v3369_v41 = vsub.f32 %v1742_v11, %v1775_v32  ;;  %v1801_v49 = vsel %vm819_vm2, %v1789_v37, 0.0  ;;  %2732 = vmatpush3.bf16.msra.mxu1 %v1890_v43 }
 0x844   : > { %v1769_v50 = vpop.xlane.xlu1 %1768  ;;  %1805 = vadd.xlane.f32.xlu1 %v1804_v42  ;;  %1802 = vadd.xlane.f32.xlu0 %v1801_v49  ;;  %v1766_v51 = vpop.xlane.xlu0 %1765 }
 0x845   : > { %v1778_v53 = vmul.f32 0.03125, %v1769_v50  ;;  %v1777_v56 = vmul.f32 0.03125, %v1766_v51  ;;  %v1792_v57 = vmul.f32 %v3367_v39, %v3367_v39  ;;  %v1791_v58 = vmul.f32 %v3369_v41, %v3369_v41 }
 0x847   : > { %v3377_v59 = vsub.f32 %v1745_v33, %v1778_v53  ;;  %v3379_v60 = vsub.f32 %v1744_v35, %v1777_v56  ;;  %v1810_v2 = vsel %vm819_vm2, %v1792_v57, 0.0  ;;  %v1807_v3 = vsel %vm819_vm2, %v1791_v58, 0.0 }
 0x848   : > { %1811 = vadd.xlane.f32.xlu1 %v1810_v2  ;;  %1808 = vadd.xlane.f32.xlu0 %v1807_v3 }
 0x849   : > { %v1794_v6 = vmul.f32 %v3377_v59, %v3377_v59  ;;  %v1793_v7 = vmul.f32 %v3379_v60, %v3379_v60 }
 0x84b   : > { %v1816_v8 = vsel %vm819_vm2, %v1794_v6, 0.0  ;;  %v1813_v9 = vsel %vm819_vm2, %v1793_v7, 0.0 }
 0x84c   : > { %1817 = vadd.xlane.f32.xlu1 %v1816_v8  ;;  %1814 = vadd.xlane.f32.xlu0 %v1813_v9 }
 0x8cb   : > { %v1797_v28 = vpop.xlane.xlu0 %1796 }
 0x8cc   : > { %v1819_v44 = vmul.f32 0.03125, %v1797_v28  ;;  %v2032_v28 = vld [vmem:[%s3548_s13 + $0x8] sm:$0xff] }
 0x8cd   : > { %v1800_v47 = vpop.xlane.xlu1 %1799 }
 0x8ce   : > { %v1827_v61 = vadd.f32 1e-05, %v1819_v44  ;;  %v1820_v5 = vmul.f32 0.03125, %v1800_v47  ;;  %v2033_v47 = vld [vmem:[%s3548_s13 + $0x10] sm:$0xff] }
 0x8d0   : > { %2823 = vrsqrt.f32 %v1827_v61  ;;  %v1828_v29 = vadd.f32 1e-05, %v1820_v5  ;;  %v2034_v61 = vld [vmem:[%s3548_s13 + $0x18] sm:$0xff] }
 0x8d1   : > { %v1806_v26 = vpop.xlane.xlu1 %1805  ;;  %v1803_v63 = vpop.xlane.xlu0 %1802  ;;  %v2044_v5 = vpack.c.bf16 %v2034_v61, %v2033_v47 }
 0x8d2   : > { %2825 = vrsqrt.f32 %v1828_v29  ;;  %v1822_v54 = vmul.f32 0.03125, %v1806_v26  ;;  %v1821_v11 = vmul.f32 0.03125, %v1803_v63  ;;  %v2035_v29 = vld [vmem:[%s3548_s13 + $0x20] sm:$0xff]  ;;  %v2036_v26 = vld [vmem:[%s3548_s13 + $0x28] sm:$0xff] }
 0x8d3   : > { %v2045_v63 = vpack.c.bf16 %v2036_v26, %v2035_v29 }
 0x8d4   : > { %v1830_v30 = vadd.f32 1e-05, %v1822_v54  ;;  %v1829_v55 = vadd.f32 1e-05, %v1821_v11  ;;  %v2037_v54 = vld [vmem:[%s3548_s13 + $0x30] sm:$0xff]  ;;  %v2038_v11 = vld [vmem:[%s3548_s13 + $0x38] sm:$0xff] }
 0x8d5   : > { %v1812_v12 = vpop.xlane.xlu1 %1811  ;;  %v1809_v33 = vpop.xlane.xlu0 %1808 }
 0x8d6   : > { %2827 = vrsqrt.f32 %v1830_v30  ;;  %v1824_v35 = vmul.f32 0.03125, %v1812_v12  ;;  %v1823_v17 = vmul.f32 0.03125, %v1809_v33  ;;  %v2046_v30 = vpack.c.bf16 %v2038_v11, %v2037_v54  ;;  %v2148_v12 = vld [vmem:[%s3550_s15 + $0x8] sm:$0xff] }
 0x8d7   : > { %2829 = vrsqrt.f32 %v1829_v55  ;;  %v2147_v55 = vld [vmem:[%s3550_s15] sm:$0xff] }
 0x8d8   : > { %v1832_v4 = vadd.f32 1e-05, %v1824_v35  ;;  %v1831_v36 = vadd.f32 1e-05, %v1823_v17  ;;  %v2155_v33 = vpack.c.bf16 %v2148_v12, %v2147_v55  ;;  %v2480_v35 = vld [vmem:[%s3547_s12] ss:$0 sm:$0xff] }
 0x8d9   : > { %v1818_v1 = vpop.xlane.xlu1 %1817  ;;  %v1815_v18 = vpop.xlane.xlu0 %1814 }
 0x8da   : > { %v2824_v19 = vpop.eup %2823  ;;  %2831 = vrsqrt.f32 %v1832_v4  ;;  %v1826_v38 = vmul.f32 0.03125, %v1818_v1  ;;  %v1825_v34 = vmul.f32 0.03125, %v1815_v18  ;;  %2757 = vmatprep.subr.bf16.mxu1 %v2155_v33 }
 0x8db   : > { %v1843_v21 = vmul.f32 %v2824_v19, %v3349_v40  ;;  %2833 = vrsqrt.f32 %v1831_v36 }
 0x8dc   : > { %v2826_v46 = vpop.eup %2825  ;;  %v1834_v22 = vadd.f32 1e-05, %v1826_v38  ;;  %v1833_v0 = vadd.f32 1e-05, %v1825_v34 }
 0x8dd   : > { %v1844_v24 = vmul.f32 %v2826_v46, %v3351_v20  ;;  %v1858_v45 = vmul.f32 %v2478_v10, %v1843_v21 }
 0x8de   : > { %2835 = vrsqrt.f32 %v1834_v22 }
 0x8df   : > { %2837 = vrsqrt.f32 %v1833_v0  ;;  %v1859_v27 = vmul.f32 %v2478_v10, %v1844_v24  ;;  %v3410_v42 = vadd.f32 %v2479_v52, %v1858_v45 }
 0x8e0   : > { %v2828_v31 = vpop.eup %2827 }
 0x8e1   : > { %v2830_v32 = vpop.eup %2829  ;;  %v1846_v37 = vmul.f32 %v2828_v31, %v3355_v62  ;;  %v3412_v40 = vadd.f32 %v2479_v52, %v1859_v27 }
 0x8e2   : > { %v1845_v49 = vmul.f32 %v2830_v32, %v3360_v23 }
 0x8e3   : > { %v1861_v50 = vmul.f32 %v2478_v10, %v1846_v37  ;;  %v1885_v20 = vpack.c.bf16 %v3412_v40, %v3410_v42 }
 0x8e4   : > { %v2832_v51 = vpop.eup %2831  ;;  %v1860_v53 = vmul.f32 %v2478_v10, %v1845_v49 }
 0x8e5   : > { %v2834_v56 = vpop.eup %2833  ;;  %v1848_v57 = vmul.f32 %v2832_v51, %v3367_v39  ;;  %2733 = vmatprep.mubr.msk.bf16.mxu1 %vm819_vm2, %v1885_v20  ;;  %v3419_v58 = vadd.f32 %v2479_v52, %v1861_v50 }
 0x8e6   : > { %v1847_v62 = vmul.f32 %v2834_v56, %v3369_v41  ;;  %v3422_v2 = vadd.f32 %v2479_v52, %v1860_v53 }
 0x8e7   : > { %v1863_v3 = vmul.f32 %v2478_v10, %v1848_v57 }
 0x8e8   : > { %v2836_v6 = vpop.eup %2835  ;;  %v1886_v23 = vpack.c.bf16 %v3419_v58, %v3422_v2  ;;  %v1862_v7 = vmul.f32 %v2478_v10, %v1847_v62 }
 0x8e9   : > { %v2838_v8 = vpop.eup %2837  ;;  %v1850_v9 = vmul.f32 %v2836_v6, %v3377_v59  ;;  %v3427_v13 = vadd.f32 %v2479_v52, %v1863_v3 }
 0x8ea   : > { %v1849_v39 = vmul.f32 %v2838_v8, %v3379_v60  ;;  %2734 = vmatmul.mubr.msk.bf16.vlgmr.msra.gmra.mrb[24].mxu1 %vm819_vm2, %v1886_v23  ;;  %v3431_v14 = vadd.f32 %v2479_v52, %v1862_v7  ;;  %v2031_v60 = vld [vmem:[%s3548_s13] sm:$0xff] }
 0x8eb   : > { %v1865_v41 = vmul.f32 %v2478_v10, %v1850_v9  ;;  %v2043_v44 = vpack.c.bf16 %v2032_v28, %v2031_v60  ;;  %2758 = vmatpush3.bf16.msra.mxu1 %v2155_v33 }
 0x8ec   : > { %v1887_v15 = vpack.c.bf16 %v3427_v13, %v3431_v14  ;;  %v1864_v16 = vmul.f32 %v2478_v10, %v1849_v39 }
 0x8ed   : > { %v3435_v48 = vadd.f32 %v2479_v52, %v1865_v41  ;;  %2741 = vmatprep.subr.bf16.mxu0 %v2043_v44 }
 0x8ee   : > { %2737 = vmatprep.mubr.msk.bf16.mxu1 %vm819_vm2, %v1887_v15  ;;  %v3438_v43 = vadd.f32 %v2479_v52, %v1864_v16  ;;  %2742 = vmatpush3.bf16.msra.mxu0 %v2043_v44 }
 0x8ef   : > { %2743 = vmatprep.subr.bf16.mxu0 %v2044_v5 }
 0x8f0   : > { %v1888_v59 = vpack.c.bf16 %v3435_v48, %v3438_v43 }
 0x8f2   : > { %2738 = vmatmul.mubr.msk.bf16.gmra.mrb[28].mxu1 %vm819_vm2, %v1888_v59  ;;  %2744 = vmatpush3.bf16.msra.mxu0 %v2044_v5 }
 0x8f3   : > { %2745 = vmatprep.subr.bf16.mxu0 %v2045_v63 }
 0x8f6   : > { %2746 = vmatpush3.bf16.msra.mxu0 %v2045_v63 }
 0x8f7   : > { %2747 = vmatprep.subr.bf16.mxu0 %v2046_v30 }
 0x8fa   : > { %2748 = vmatpush3.bf16.msra.mxu0 %v2046_v30 }
 0x9bd   : > { %v2735_v17 = vpop.f32.mrb[24].mxu1 }
 0x9be   : > { %v1953_v4 = vadd.f32 %v2735_v17, %v2480_v35  ;;  %v1944_v36 = vpop.f32.mrb[25].mxu1 }
 0x9bf   : > { %v1945_v1 = vadd.f32 %v2480_v35, %v1944_v36  ;;  %v2736_v18 = vpop.f32.mrb[26].mxu1 }
 0x9c0   : > { %v2487_v19 = vmul.f32 -1.442695, %v1953_v4  ;;  %v1956_v10 = vadd.f32 %v2736_v18, %v2480_v35  ;;  %v1947_v38 = vpop.f32.mrb[27].mxu1 }
 0x9c1   : > { %v2485_v34 = vmul.f32 -1.442695, %v1945_v1  ;;  %v1948_v21 = vadd.f32 %v2480_v35, %v1947_v38 }
 0x9c2   : > { %2839 = vpow2.f32 %v2487_v19  ;;  %v2488_v46 = vmul.f32 -1.442695, %v1956_v10 }
 0x9c3   : > { %2841 = vpow2.f32 %v2485_v34  ;;  %v2486_v22 = vmul.f32 -1.442695, %v1948_v21 }
 0x9c4   : > { %2843 = vpow2.f32 %v2488_v46 }
 0x9c5   : > { %2845 = vpow2.f32 %v2486_v22  ;;  %v2739_v0 = vpop.f32.mrb[28].mxu1  ;;  %v2497_v22 = vld [vmem:[%s3549_s14] ss:$0 sm:$0xff] }
 0x9c6   : > { %v1969_v24 = vadd.f32 %v2739_v0, %v2480_v35  ;;  %v1960_v45 = vpop.f32.mrb[29].mxu1 }
 0x9c7   : > { %v1961_v52 = vadd.f32 %v2480_v35, %v1960_v45  ;;  %v2740_v27 = vpop.f32.mrb[30].mxu1 }
 0x9c8   : > { %v2491_v31 = vmul.f32 -1.442695, %v1969_v24  ;;  %v1972_v32 = vadd.f32 %v2740_v27, %v2480_v35  ;;  %v1963_v37 = vpop.f32.mrb[31].mxu1 }
 0x9c9   : > { %v2489_v49 = vmul.f32 -1.442695, %v1961_v52  ;;  %v1964_v50 = vadd.f32 %v2480_v35, %v1963_v37 }
 0x9ca   : > { %2847 = vpow2.f32 %v2491_v31  ;;  %v2492_v20 = vmul.f32 -1.442695, %v1972_v32 }
 0x9cb   : > { %2849 = vpow2.f32 %v2489_v49  ;;  %v2490_v51 = vmul.f32 -1.442695, %v1964_v50 }
 0x9cc   : > { %v2840_v53 = vpop.eup %2839  ;;  %2851 = vpow2.f32 %v2492_v20 }
 0x9cd   : > { %v2842_v56 = vpop.eup %2841  ;;  %v2001_v57 = vadd.f32 1.0, %v2840_v53  ;;  %2853 = vpow2.f32 %v2490_v51 }
 0x9ce   : > { %v2844_v62 = vpop.eup %2843  ;;  %v1999_v3 = vadd.f32 1.0, %v2842_v56 }
 0x9cf   : > { %v2846_v6 = vpop.eup %2845  ;;  %2855 = vrcp.f32 %v2001_v57  ;;  %v2002_v23 = vadd.f32 1.0, %v2844_v62 }
 0x9d0   : > { %2857 = vrcp.f32 %v1999_v3  ;;  %v2000_v7 = vadd.f32 1.0, %v2846_v6 }
 0x9d1   : > { %2859 = vrcp.f32 %v2002_v23 }
 0x9d2   : > { %2861 = vrcp.f32 %v2000_v7 }
 0x9d4   : > { %v2848_v8 = vpop.eup %2847 }
 0x9d5   : > { %v2850_v9 = vpop.eup %2849  ;;  %v2005_v39 = vadd.f32 1.0, %v2848_v8 }
 0x9d6   : > { %v2852_v41 = vpop.eup %2851  ;;  %v2003_v15 = vadd.f32 1.0, %v2850_v9 }
 0x9d7   : > { %v2854_v16 = vpop.eup %2853  ;;  %2863 = vrcp.f32 %v2005_v39  ;;  %v2006_v59 = vadd.f32 1.0, %v2852_v41 }
 0x9d8   : > { %2865 = vrcp.f32 %v2003_v15  ;;  %v2004_v60 = vadd.f32 1.0, %v2854_v16 }
 0x9d9   : > { %v2856_v28 = vpop.eup %2855  ;;  %2867 = vrcp.f32 %v2006_v59 }
 0x9da   : > { %v2858_v44 = vpop.eup %2857  ;;  %2869 = vrcp.f32 %v2004_v60  ;;  %v2025_v5 = vmul.f32 %v2856_v28, %v1953_v4  ;;  %v2149_v4 = vld [vmem:[%s3550_s15 + $0x10] sm:$0xff] }
 0x9db   : > { %v2860_v47 = vpop.eup %2859  ;;  %v2023_v26 = vmul.f32 %v2858_v44, %v1945_v1  ;;  %v2150_v1 = vld [vmem:[%s3550_s15 + $0x18] sm:$0xff] }
 0x9dc   : > { %v2862_v61 = vpop.eup %2861  ;;  %v2026_v29 = vmul.f32 %v2860_v47, %v1956_v10  ;;  %v2156_v10 = vpack.c.bf16 %v2150_v1, %v2149_v4 }
 0x9dd   : > { %v2024_v63 = vmul.f32 %v2862_v61, %v1948_v21 }
 0x9de   : > { %v2040_v54 = vpack.c.bf16 %v2026_v29, %v2025_v5  ;;  %2759 = vmatprep.subr.bf16.mxu1 %v2156_v10 }
 0x9df   : > { %v2039_v11 = vpack.c.bf16 %v2024_v63, %v2023_v26  ;;  %2760 = vmatpush3.bf16.msra.mxu1 %v2156_v10  ;;  %v2297_v10 = vld [vmem:[%s3552_s17] sm:$0x1] }
 0x9e1   : > { %v2864_v30 = vpop.eup %2863  ;;  %2749 = vmatprep.mubr.msk.bf16.mxu0 %vm757_vm4, %v2039_v11 }
 0x9e2   : > { %v2866_v55 = vpop.eup %2865  ;;  %2750 = vmatmul.mubr.msk.bf16.vlgmr.msra.gmra.mrb[36].mxu0 %vm757_vm4, %v2040_v54  ;;  %v2029_v35 = vmul.f32 %v2864_v30, %v1969_v24 }
 0x9e3   : > { %v2868_v12 = vpop.eup %2867  ;;  %v2027_v36 = vmul.f32 %v2866_v55, %v1961_v52 }
 0x9e4   : > { %v2870_v33 = vpop.eup %2869  ;;  %v2030_v17 = vmul.f32 %v2868_v12, %v1972_v32 }
 0x9e5   : > { %v2028_v18 = vmul.f32 %v2870_v33, %v1964_v50 }
 0x9e6   : > { %v2042_v19 = vpack.c.bf16 %v2030_v17, %v2029_v35 }
 0x9e7   : > { %v2041_v38 = vpack.c.bf16 %v2028_v18, %v2027_v36 }
 0x9e9   : > { %2753 = vmatprep.mubr.msk.bf16.mxu0 %vm757_vm4, %v2041_v38 }
 0x9ea   : > { %2754 = vmatmul.mubr.msk.bf16.gmra.mrb[40].mxu0 %vm757_vm4, %v2042_v19 }
 0xab5   : > { %v2751_v34 = vpop.f32.mrb[36].mxu0 }
 0xab6   : > { %v2126_v21 = vadd.f32 %v2751_v34, %v3422_v2  ;;  %v2093_v46 = vpop.f32.mrb[37].mxu0 }
 0xab7   : > { %v2124_v0 = vadd.f32 %v2093_v46, %v3410_v42  ;;  %v2752_v24 = vpop.f32.mrb[38].mxu0 }
 0xab8   : > { %v2127_v45 = vadd.f32 %v2752_v24, %v3419_v58  ;;  %v2096_v52 = vpop.f32.mrb[39].mxu0  ;;  %v2141_v31 = vadd.f32 %v2497_v22, %v2126_v21 }
 0xab9   : > { %v2125_v27 = vadd.f32 %v2096_v52, %v3412_v40  ;;  %v2139_v37 = vadd.f32 %v2497_v22, %v2124_v0  ;;  %v2298_v0 = vpack.c.bf16 %v2297_v10, %v2297_v10 }
 0xaba   : > { %v2142_v32 = vadd.f32 %v2497_v22, %v2127_v45 }
 0xabb   : > { %v2140_v49 = vadd.f32 %v2497_v22, %v2125_v27 }
 0xabc   : > { %v2152_v50 = vpack.c.bf16 %v2142_v32, %v2141_v31 }
 0xabd   : > { %v2151_v20 = vpack.c.bf16 %v2140_v49, %v2139_v37  ;;  %v2755_v2 = vpop.f32.mrb[40].mxu0  ;;  %v2299_v37 = vunpack.c.l.bf16 %v2298_v0 }
 0xabe   : > { %v2130_v51 = vadd.f32 %v2755_v2, %v3438_v43  ;;  %v2109_v53 = vpop.f32.mrb[41].mxu0 }
 0xabf   : > { %v2128_v56 = vadd.f32 %v2109_v53, %v3431_v14  ;;  %v2756_v57 = vpop.f32.mrb[42].mxu0  ;;  %2761 = vmatprep.mubr.msk.bf16.mxu1 %vm819_vm2, %v2151_v20  ;;  %v2498_v14 = vld [vmem:[%s3551_s16] ss:$0 sm:$0xff] }
 0xac0   : > { %v2131_v42 = vadd.f32 %v2756_v57, %v3435_v48  ;;  %v2112_v58 = vpop.f32.mrb[43].mxu0  ;;  %2762 = vmatmul.mubr.msk.bf16.vlgmr.msra.gmra.mrb[32].mxu1 %vm819_vm2, %v2152_v50  ;;  %v2145_v62 = vadd.f32 %v2497_v22, %v2130_v51 }
 0xac1   : > { %v2129_v40 = vadd.f32 %v2112_v58, %v3427_v13  ;;  %v2143_v6 = vadd.f32 %v2497_v22, %v2128_v56  ;;  %v2315_v56 = vrot.slane %v2299_v37, %v3259_v25 }
 0xac2   : > { %v2146_v3 = vadd.f32 %v2497_v22, %v2131_v42 }
 0xac3   : > { %v2144_v23 = vadd.f32 %v2497_v22, %v2129_v40 }
 0xac4   : > { %v2154_v7 = vpack.c.bf16 %v2146_v3, %v2145_v62 }
 0xac5   : > { %v2153_v8 = vpack.c.bf16 %v2144_v23, %v2143_v6 }
 0xac7   : > { %2765 = vmatprep.mubr.msk.bf16.mxu1 %vm819_vm2, %v2153_v8 }
 0xac8   : > { %2766 = vmatmul.mubr.msk.bf16.gmra.mrb[36].mxu1 %vm819_vm2, %v2154_v7 }
 0xb93   : > { %v2763_v48 = vpop.f32.mrb[32].mxu1 }
 0xb94   : > { %v2219_v43 = vadd.f32 %v2763_v48, %v2498_v14  ;;  %v2210_v9 = vpop.f32.mrb[33].mxu1 }
 0xb95   : > { %v2211_v39 = vadd.f32 %v2498_v14, %v2210_v9  ;;  %v2764_v41 = vpop.f32.mrb[34].mxu1 }
 0xb96   : > { %v2505_v13 = vmul.f32 -1.442695, %v2219_v43  ;;  %v2222_v15 = vadd.f32 %v2764_v41, %v2498_v14  ;;  %v2213_v16 = vpop.f32.mrb[35].mxu1 }
 0xb97   : > { %v2503_v59 = vmul.f32 -1.442695, %v2211_v39  ;;  %v2214_v60 = vadd.f32 %v2498_v14, %v2213_v16 }
 0xb98   : > { %2871 = vpow2.f32 %v2505_v13  ;;  %v2506_v28 = vmul.f32 -1.442695, %v2222_v15 }
 0xb99   : > { %2873 = vpow2.f32 %v2503_v59  ;;  %v2504_v44 = vmul.f32 -1.442695, %v2214_v60 }
 0xb9a   : > { %2875 = vpow2.f32 %v2506_v28 }
 0xb9b   : > { %2877 = vpow2.f32 %v2504_v44  ;;  %v2767_v47 = vpop.f32.mrb[36].mxu1 }
 0xb9c   : > { %v2235_v61 = vadd.f32 %v2767_v47, %v2498_v14  ;;  %v2226_v5 = vpop.f32.mrb[37].mxu1 }
 0xb9d   : > { %v3504_v29 = vadd.f32 %v2498_v14, %v2226_v5  ;;  %v2768_v26 = vpop.f32.mrb[38].mxu1 }
 0xb9e   : > { %v2509_v63 = vmul.f32 -1.442695, %v2235_v61  ;;  %v2238_v54 = vadd.f32 %v2768_v26, %v2498_v14  ;;  %v2229_v11 = vpop.f32.mrb[39].mxu1 }
 0xb9f   : > { %v2507_v30 = vmul.f32 -1.442695, %v3504_v29  ;;  %v2230_v55 = vadd.f32 %v2498_v14, %v2229_v11 }
 0xba0   : > { %2879 = vpow2.f32 %v2509_v63  ;;  %v2510_v12 = vmul.f32 -1.442695, %v2238_v54 }
 0xba1   : > { %2881 = vpow2.f32 %v2507_v30  ;;  %v2508_v33 = vmul.f32 -1.442695, %v2230_v55 }
 0xba2   : > { %v2872_v35 = vpop.eup %2871  ;;  %2883 = vpow2.f32 %v2510_v12 }
 0xba3   : > { %v2874_v17 = vpop.eup %2873  ;;  %v2267_v36 = vadd.f32 1.0, %v2872_v35  ;;  %2885 = vpow2.f32 %v2508_v33  ;;  %v2511_v35 = vld [vmem:[#allocation2] ss:$0 sm:$0xff] }
 0xba4   : > { %v2876_v18 = vpop.eup %2875  ;;  %v2265_v19 = vadd.f32 1.0, %v2874_v17 }
 0xba5   : > { %v2878_v38 = vpop.eup %2877  ;;  %2887 = vrcp.f32 %v2267_v36  ;;  %v2268_v4 = vadd.f32 1.0, %v2876_v18 }
 0xba6   : > { %2889 = vrcp.f32 %v2265_v19  ;;  %v2266_v1 = vadd.f32 1.0, %v2878_v38 }
 0xba7   : > { %2891 = vrcp.f32 %v2268_v4 }
 0xba8   : > { %2893 = vrcp.f32 %v2266_v1 }
 0xbaa   : > { %v2880_v34 = vpop.eup %2879 }
 0xbab   : > { %v2882_v21 = vpop.eup %2881  ;;  %v2271_v46 = vadd.f32 1.0, %v2880_v34 }
 0xbac   : > { %v2884_v22 = vpop.eup %2883  ;;  %v2269_v24 = vadd.f32 1.0, %v2882_v21 }
 0xbad   : > { %v2886_v45 = vpop.eup %2885  ;;  %2895 = vrcp.f32 %v2271_v46  ;;  %v2272_v52 = vadd.f32 1.0, %v2884_v22 }
 0xbae   : > { %2897 = vrcp.f32 %v2269_v24  ;;  %v2270_v27 = vadd.f32 1.0, %v2886_v45 }
 0xbaf   : > { %v2888_v31 = vpop.eup %2887  ;;  %2899 = vrcp.f32 %v2272_v52 }
 0xbb0   : > { %v2890_v32 = vpop.eup %2889  ;;  %2901 = vrcp.f32 %v2270_v27  ;;  %v2291_v20 = vmul.f32 %v2888_v31, %v2219_v43 }
 0xbb1   : > { %v2892_v49 = vpop.eup %2891  ;;  %v2289_v51 = vmul.f32 %v2890_v32, %v2211_v39 }
 0xbb2   : > { %v2894_v50 = vpop.eup %2893  ;;  %v2292_v2 = vmul.f32 %v2892_v49, %v2222_v15 }
 0xbb3   : > { %v2290_v53 = vmul.f32 %v2894_v50, %v2214_v60 }
 0xbb4   : > { %v2301_v57 = vpack.c.bf16 %v2292_v2, %v2291_v20 }
 0xbb5   : > { %v2300_v42 = vpack.c.bf16 %v2290_v53, %v2289_v51 }
 0xbb6   : > { %v2307_v58 = vunpack.c.h.bf16 %v2301_v57  ;;  %v2306_v40 = vunpack.c.l.bf16 %v2301_v57 }
 0xbb7   : > { %v2896_v62 = vpop.eup %2895  ;;  %v2305_v3 = vunpack.c.h.bf16 %v2300_v42  ;;  %v2304_v6 = vunpack.c.l.bf16 %v2300_v42 }
 0xbb8   : > { %v2898_v23 = vpop.eup %2897  ;;  %v2319_v7 = vmul.f32 %v2315_v56, %v2307_v58  ;;  %v2318_v8 = vmul.f32 %v2315_v56, %v2306_v40  ;;  %v2295_v48 = vmul.f32 %v2896_v62, %v2235_v61 }
 0xbb9   : > { %v2900_v14 = vpop.eup %2899  ;;  %v2317_v9 = vmul.f32 %v2315_v56, %v2305_v3  ;;  %v2316_v25 = vmul.f32 %v2315_v56, %v2304_v6  ;;  %v2293_v15 = vmul.f32 %v2898_v23, %v3504_v29 }
 0xbba   : > { %v2902_v41 = vpop.eup %2901  ;;  %v2296_v43 = vmul.f32 %v2900_v14, %v2238_v54  ;;  %v2333_v39 = vsel %vm757_vm4, %v2319_v7, 0.0  ;;  %v2330_v13 = vsel %vm757_vm4, %v2318_v8, 0.0 }
 0xbbb   : > { %v2294_v16 = vmul.f32 %v2902_v41, %v2230_v55  ;;  %2334 = vadd.xlane.f32.xlu1 %v2333_v39  ;;  %2331 = vadd.xlane.f32.xlu0 %v2330_v13  ;;  %v2327_v28 = vsel %vm757_vm4, %v2317_v9, 0.0  ;;  %v2324_v44 = vsel %vm757_vm4, %v2316_v25, 0.0 }
 0xbbc   : > { %v2303_v59 = vpack.c.bf16 %v2296_v43, %v2295_v48 }
 0xbbd   : > { %v2302_v60 = vpack.c.bf16 %v2294_v16, %v2293_v15 }
 0xbbe   : > { %v2311_v5 = vunpack.c.h.bf16 %v2303_v59  ;;  %v2310_v26 = vunpack.c.l.bf16 %v2303_v59 }
 0xbbf   : > { %2328 = vadd.xlane.f32.xlu1 %v2327_v28  ;;  %2325 = vadd.xlane.f32.xlu0 %v2324_v44  ;;  %v2309_v47 = vunpack.c.h.bf16 %v2302_v60  ;;  %v2308_v61 = vunpack.c.l.bf16 %v2302_v60 }
 0xbc0   : > { %v2323_v30 = vmul.f32 %v2315_v56, %v2311_v5  ;;  %v2322_v55 = vmul.f32 %v2315_v56, %v2310_v26 }
 0xbc1   : > { %v2321_v63 = vmul.f32 %v2315_v56, %v2309_v47  ;;  %v2320_v54 = vmul.f32 %v2315_v56, %v2308_v61 }
 0xbc2   : > { %v2345_v12 = vsel %vm757_vm4, %v2323_v30, 0.0  ;;  %v2342_v33 = vsel %vm757_vm4, %v2322_v55, 0.0 }
 0xbc3   : > { %v2339_v29 = vsel %vm757_vm4, %v2321_v63, 0.0  ;;  %v2336_v11 = vsel %vm757_vm4, %v2320_v54, 0.0 }
 0xbc4   : > { %2340 = vadd.xlane.f32.xlu1 %v2339_v29  ;;  %2337 = vadd.xlane.f32.xlu0 %v2336_v11 }
 0xbc8   : > { %2346 = vadd.xlane.f32.xlu1 %v2345_v12  ;;  %2343 = vadd.xlane.f32.xlu0 %v2342_v33 }
 0xc48   : > { %v2335_v17 = vpop.xlane.xlu1 %2334  ;;  %v2332_v36 = vpop.xlane.xlu0 %2331 }
 0xc49   : > { %v2358_v18 = vadd.f32 %v2511_v35, %v2335_v17  ;;  %v2357_v19 = vadd.f32 %v2511_v35, %v2332_v36 }
 0xc4b   : > { %2367 = vst.msk [vmem:[%s624_s18 + $0x18] sm:$0xff] %vm2363_vm6, %v2358_v18  ;;  %2366 = vst.msk [vmem:[%s624_s18 + $0x10] sm:$0xff] %vm2363_vm6, %v2357_v19 }
 0xc4c   : > { %v2329_v38 = vpop.xlane.xlu1 %2328  ;;  %v2326_v4 = vpop.xlane.xlu0 %2325 }
 0xc4d   : > { %v2356_v1 = vadd.f32 %v2511_v35, %v2329_v38  ;;  %v2355_v10 = vadd.f32 %v2511_v35, %v2326_v4 }
 0xc4f   : > { %2365 = vst.msk [vmem:[%s624_s18 + $0x8] sm:$0xff] %vm2363_vm6, %v2356_v1  ;;  %2364 = vst.msk [vmem:[%s624_s18] sm:$0xff] %vm2363_vm6, %v2355_v10 }
 0xc51   : > { %v2341_v34 = vpop.xlane.xlu1 %2340  ;;  %v2338_v21 = vpop.xlane.xlu0 %2337 }
 0xc52   : > { %v2360_v46 = vadd.f32 %v2511_v35, %v2341_v34  ;;  %v2359_v22 = vadd.f32 %v2511_v35, %v2338_v21 }
 0xc54   : > { %2369 = vst.msk [vmem:[%s624_s18 + $0x28] sm:$0xff] %vm2363_vm6, %v2360_v46  ;;  %2368 = vst.msk [vmem:[%s624_s18 + $0x20] sm:$0xff] %vm2363_vm6, %v2359_v22 }
 0xc55   : > { %v2347_v0 = vpop.xlane.xlu1 %2346  ;;  %v2344_v24 = vpop.xlane.xlu0 %2343 }
 0xc56   : > { %v2362_v45 = vadd.f32 %v2511_v35, %v2347_v0  ;;  %v2361_v52 = vadd.f32 %v2511_v35, %v2344_v24 }
 0xc58   : > { %2371 = vst.msk [vmem:[%s624_s18 + $0x38] sm:$0xff] %vm2363_vm6, %v2362_v45  ;;  %2370 = vst.msk [vmem:[%s624_s18 + $0x30] sm:$0xff] %vm2363_vm6, %v2361_v52 }
 0xc59 PF: > { %s31_s20 = sadd.s32 1, %s2909_s20  }
 0xc5a   : > { %p28_p4 = scmp.ge.s32.totalorder %s31_s20, 4  }
 0xc5c   :  { %30 = sbr.rel (!%p28_p4) target bundleno = 5 (0x5), region = 129 }

</bundles_post_ra>
